<compile_context>
chip_gen: v7x
topology: tpu7x:2x2x1
jax: 0.10.0
libtpu: 0.0.40
codegen_flags: <defaults>
</compile_context>

<pallas_src>
import jax
import jax.numpy as jnp
from jax.experimental import pallas as pl
from jax.experimental.pallas import tpu as pltpu


def _fused_add_relu_conv1x1_kernel(a_ref, b_ref, w_ref, o_ref):
    # a_ref, b_ref: [1, Cin, M]   (one batch element, full Cin)      bf16
    # w_ref:        [TCO, Cin]    (one Cout tile, full Cin)          bf16
    # o_ref:        [1, TCO, M]                                      f32
    # add + ReLU on the VPU; 1x1-conv as a single MXU matmul (f32 accumulate).
    s = jnp.maximum(a_ref[0] + b_ref[0], 0)                          # [Cin, M] bf16
    o_ref[0] = jnp.dot(
        w_ref[...], s, preferred_element_type=jnp.float32
    ).astype(o_ref.dtype)                                            # [TCO, M]


def fused_add_relu_conv1x1(x358, x350, weight, *, tco=128,
                           compute_dtype=jnp.bfloat16):
    """x358, x350: [N, Cin, H, W] (NCHW). weight: [Cout, Cin, 1, 1] (no bias)."""
    N, Cin, H, W = x358.shape
    Cout = weight.shape[0]
    M = H * W

    # Free reshapes (no transposes); bf16 cast halves the HBM->VMEM stream.
    a = x358.reshape(N, Cin, M).astype(compute_dtype)
    b = x350.reshape(N, Cin, M).astype(compute_dtype)
    w = weight.reshape(Cout, Cin).astype(compute_dtype)

    if Cout % tco != 0:
        tco = Cout  # fall back to a single Cout block
    nc = Cout // tco

    in_bytes = jnp.dtype(compute_dtype).itemsize
    cost = pl.CostEstimate(
        flops=2 * N * Cout * Cin * M,
        transcendentals=0,
        bytes_accessed=in_bytes * (2 * N * Cin * M + Cout * Cin) + 4 * N * Cout * M,
    )

    out_flat = pl.pallas_call(
        _fused_add_relu_conv1x1_kernel,
        out_shape=jax.ShapeDtypeStruct((N, Cout, M), jnp.float32),
        grid_spec=pltpu.PrefetchScalarGridSpec(
            num_scalar_prefetch=0,
            grid=(nc, N),  # leading Cout axis -> v7x dual-TC; batch innermost
            in_specs=[
                pl.BlockSpec((1, Cin, M), lambda c, n: (n, 0, 0)),
                pl.BlockSpec((1, Cin, M), lambda c, n: (n, 0, 0)),
                # W block index independent of n -> fetched once per Cout tile,
                # never re-streamed per batch element.
                pl.BlockSpec((tco, Cin), lambda c, n: (c, 0)),
            ],
            out_specs=pl.BlockSpec((1, tco, M), lambda c, n: (n, c, 0)),
        ),
        compiler_params=pltpu.CompilerParams(
            dimension_semantics=("parallel", "parallel"),
        ),
        cost_estimate=cost,
    )(a, b, w)

    # Free reshape back to NCHW.
    return out_flat.reshape(N, Cout, H, W)


def reference_f32(x358, x350, weight):
    s = jnp.maximum(x358 + x350, 0.0)
    w = weight.reshape(weight.shape[0], weight.shape[1])  # [Cout, Cin]
    return jnp.einsum("nchw,oc->nohw", s, w, precision=jax.lax.Precision.HIGHEST)


def reference_bf16_inputs(x358, x350, weight):
    # Same math, with inputs rounded to bf16 (isolates the intended quantization
    # from the kernel wiring) but accumulation in f32.
    a = x358.astype(jnp.bfloat16).astype(jnp.float32)
    b = x350.astype(jnp.bfloat16).astype(jnp.float32)
    w = weight.astype(jnp.bfloat16).astype(jnp.float32)
    s = jnp.maximum(a + b, 0.0)
    w2 = w.reshape(w.shape[0], w.shape[1])
    return jnp.einsum("nchw,oc->nohw", s, w2, precision=jax.lax.Precision.HIGHEST)


if __name__ == "__main__":
    key = jax.random.PRNGKey(0)
    k1, k2, k3 = jax.random.split(key, 3)

    # Shapes from the original module.
    N, Cin, H, W = 1, 1024, 14, 14
    Cout = 256

    x358 = jax.random.normal(k1, (N, Cin, H, W), dtype=jnp.float32)
    x350 = jax.random.normal(k2, (N, Cin, H, W), dtype=jnp.float32)
    bound = 1.0 / (Cin ** 0.5)
    weight = jax.random.uniform(
        k3, (Cout, Cin, 1, 1), minval=-bound, maxval=bound, dtype=jnp.float32
    )

    out = fused_add_relu_conv1x1(x358, x350, weight)
    out = jax.block_until_ready(out)
    assert out.shape == (N, Cout, H, W), out.shape

    # Tight check: kernel matches the same math with bf16-rounded inputs.
    ref_q = reference_bf16_inputs(x358, x350, weight)
    err_q = float(jnp.max(jnp.abs(out - ref_q)))
    assert jnp.allclose(out, ref_q, atol=1e-2, rtol=1e-2), err_q

    # Loose check: drift vs the full-f32 module output stays at the expected
    # bf16-quantization level (~1e-2 abs for a 1024-deep contraction).
    ref = reference_f32(x358, x350, weight)
    err = float(jnp.max(jnp.abs(out - ref)))
    assert jnp.allclose(out, ref, atol=5e-2, rtol=1e-2), err

    print("KERNEL_OK")
</pallas_src>

<mosaic_0001>
module attributes {stable_mosaic.version = 11 : i64} {
  func.func @_fused_add_relu_conv1x1_kernel(%arg0: i32, %arg1: i32, %arg2: memref<1x1024x196xbf16, #tpu.memory_space<vmem>>, %arg3: memref<1x1024x196xbf16, #tpu.memory_space<vmem>>, %arg4: memref<128x1024xbf16, #tpu.memory_space<vmem>>, %arg5: memref<1x128x196xf32, #tpu.memory_space<vmem>>) attributes {dimension_semantics = [#tpu.dimension_semantics<parallel>, #tpu.dimension_semantics<parallel>], iteration_bounds = array<i64: 2, 1>, scalar_prefetch = 0 : i64, scratch_operands = 0 : i64, tpu.core_type = #tpu.core_type<tc>, window_params = [{transform_indices = @transform_0, window_bounds = array<i64: 1, 1024, 196>}, {transform_indices = @transform_1, window_bounds = array<i64: 1, 1024, 196>}, {transform_indices = @transform_2, window_bounds = array<i64: 128, 1024>}, {transform_indices = @transform_3, window_bounds = array<i64: 1, 128, 196>}]} {
    %c0 = arith.constant 0 : index
    %c0_0 = arith.constant 0 : index
    %c0_1 = arith.constant 0 : index
    %0 = vector.load %arg2[%c0, %c0_0, %c0_1] : memref<1x1024x196xbf16, #tpu.memory_space<vmem>>, vector<1x1024x196xbf16>
    %1 = vector.shape_cast %0 : vector<1x1024x196xbf16> to vector<1024x196xbf16>
    %c0_2 = arith.constant 0 : index
    %c0_3 = arith.constant 0 : index
    %c0_4 = arith.constant 0 : index
    %2 = vector.load %arg3[%c0_2, %c0_3, %c0_4] : memref<1x1024x196xbf16, #tpu.memory_space<vmem>>, vector<1x1024x196xbf16>
    %3 = vector.shape_cast %2 : vector<1x1024x196xbf16> to vector<1024x196xbf16>
    %4 = arith.addf %1, %3 : vector<1024x196xbf16>
    %cst = arith.constant 0.000000e+00 : bf16
    %5 = vector.broadcast %cst : bf16 to vector<1024x196xbf16>
    %6 = arith.maximumf %4, %5 : vector<1024x196xbf16>
    %c0_5 = arith.constant 0 : index
    %c0_6 = arith.constant 0 : index
    %7 = vector.load %arg4[%c0_5, %c0_6] : memref<128x1024xbf16, #tpu.memory_space<vmem>>, vector<128x1024xbf16>
    %cst_7 = arith.constant dense<0.000000e+00> : vector<128x196xf32>
    %8 = tpu.matmul %7, %6, %cst_7 {dimension_numbers = #tpu.dot_dimension_numbers<[1], [0], [0], [1], [0, 0, 1, 1], [], []>} : vector<128x1024xbf16>, vector<1024x196xbf16>, vector<128x196xf32> -> vector<128x196xf32>
    %c0_8 = arith.constant 0 : index
    %c0_9 = arith.constant 0 : index
    %c0_10 = arith.constant 0 : index
    %9 = vector.load %arg5[%c0_8, %c0_9, %c0_10] : memref<1x128x196xf32, #tpu.memory_space<vmem>>, vector<1x128x196xf32>
    %10 = vector.shape_cast %9 : vector<1x128x196xf32> to vector<128x196xf32>
    %11 = vector.shape_cast %8 : vector<128x196xf32> to vector<1x128x196xf32>
    tpu.vector_store %arg5[%c0_8, %c0_9, %c0_10], %11 {strides = array<i32>} : memref<1x128x196xf32, #tpu.memory_space<vmem>>, vector<1x128x196xf32>,
    return
  }
  func.func @transform_0(%arg0: i32, %arg1: i32) -> (i32, i32, i32) {
    %c0_i32 = arith.constant 0 : i32
    %c0_i32_0 = arith.constant 0 : i32
    %c0_i32_1 = arith.constant 0 : i32
    return %arg1, %c0_i32, %c0_i32_0 : i32, i32, i32
  }
  func.func @transform_1(%arg0: i32, %arg1: i32) -> (i32, i32, i32) {
    %c0_i32 = arith.constant 0 : i32
    %c0_i32_0 = arith.constant 0 : i32
    %c0_i32_1 = arith.constant 0 : i32
    return %arg1, %c0_i32, %c0_i32_0 : i32, i32, i32
  }
  func.func @transform_2(%arg0: i32, %arg1: i32) -> (i32, i32) {
    %c0_i32 = arith.constant 0 : i32
    %c0_i32_0 = arith.constant 0 : i32
    return %arg0, %c0_i32 : i32, i32
  }
  func.func @transform_3(%arg0: i32, %arg1: i32) -> (i32, i32, i32) {
    %c0_i32 = arith.constant 0 : i32
    %c0_i32_0 = arith.constant 0 : i32
    return %arg1, %arg0, %c0_i32 : i32, i32, i32
  }
}

</mosaic_0001>

<bundles_post_ra>
// kernel: tpu_custom_call.1
= control target key start
LH: loop header
LB: loop body
LE: loop exit
PB: predicated region body
PF: predicated region fallthrough
CT: control target
= control target key end

     0   :  { %s2755_s12 = smov 0   ;;  %s2757_s13 = smov 0   ;;  %s4337_s0 = inlined_call_operand.vmem [shape: bf16[1,1024,196], index: 0, kind: input, shape index: {}]   ;;  %s4338_s1 = inlined_call_operand.vmem [shape: bf16[1,1024,196], index: 1, kind: input, shape index: {}]   ;;  %s4339_s2 = inlined_call_operand.vmem [shape: bf16[256,1024], index: 2, kind: input, shape index: {}]   ;;  %s4340_s3 = inlined_call_operand.vmem [shape: f32[1,256,196], index: 3, kind: output, shape index: {}]  }
   0x1   :  { %s2759_s14 = smov 0  }
   0x2 LB: > { %s25_s15 = sadd.s32 1, %s2728_s13  ;;  %p2386_p0 = scmp.ge.s32.totalorder %s2732_s14, 1  ;;  %s2732_s14 = sphi %s2759_s14, %s13_s14   ;;  %s2728_s13 = sphi %s2757_s13, %s4343_s13   ;;  %s2724_s12 = sphi %s2755_s12, %s4342_s12  }
   0x3   : > { %p27_p1 = scmp.ge.s32.totalorder %s25_s15, 2  ;;  %p173_p2 = scmp.lt.s32.totalorder %s2732_s14, 3 }
   0x5   : > { %s4345_s15 = smov (%p27_p1, %s25_s15), 0  ;;  %p174_p3 = pnand %p2386_p0, %p173_p2 }
   0x6   : > { %v242_v0 = vld [vmem:[%s4337_s0] sm:$0xff] (!%p174_p3)  ;;  %v243_v1 = vld [vmem:[%s4337_s0 + $0x8] sm:$0xff] (!%p174_p3)  ;;  %v244_v10 = vld [vmem:[%s4337_s0 + $0x10] sm:$0xff] (!%p174_p3)  ;;  %v2734_v11 = vmov (!%p174_p3), 0   ;;  %s2387_s4 = sshll.u32 (!%p174_p3), %s2724_s12, 4  ;;  %vm2231_vm0 = vcmask (!%p174_p3), 556032  }
   0x7   : > { %177 = sbr.rel (%p174_p3) target bundleno = 418 (0x1a2), region = 32  ;;  %v370_v2 = vld [vmem:[%s4338_s1] sm:$0xff] (!%p174_p3)  ;;  %v371_v3 = vld [vmem:[%s4338_s1 + $0x8] sm:$0xff] (!%p174_p3)  ;;  %v245_v15 = vld [vmem:[%s4337_s0 + $0x18] sm:$0xff] (!%p174_p3)  ;;  %p3160_p4 = scmp.lt.s32.totalorder (!%p174_p3), %s2387_s4, 31 }
   0x8   : > { %v498_v4 = vadd.bf16 (!%p174_p3), %v370_v2, %v242_v0  ;;  %v306_v5 = vld [vmem:[%s4337_s0 + $0x200] sm:$0xff] (!%p174_p3)  ;;  %v307_v6 = vld [vmem:[%s4337_s0 + $0x208] sm:$0xff] (!%p174_p3)  ;;  %v499_v7 = vadd.bf16 (!%p174_p3), %v371_v3, %v243_v1  ;;  %v372_v16 = vld [vmem:[%s4338_s1 + $0x10] sm:$0xff] (!%p174_p3) }
   0x9   : > { %v434_v8 = vld [vmem:[%s4338_s1 + $0x200] sm:$0xff] (!%p174_p3)  ;;  %v435_v9 = vld [vmem:[%s4338_s1 + $0x208] sm:$0xff] (!%p174_p3)  ;;  %v373_v17 = vld [vmem:[%s4338_s1 + $0x18] sm:$0xff] (!%p174_p3)  ;;  %v500_v19 = vadd.bf16 (!%p174_p3), %v372_v16, %v244_v10 }
   0xa   : > { %v626_v12 = vmax.bf16 (!%p174_p3), %v2734_v11, %v498_v4  ;;  %v562_v13 = vadd.bf16 (!%p174_p3), %v434_v8, %v306_v5  ;;  %v563_v14 = vadd.bf16 (!%p174_p3), %v435_v9, %v307_v6  ;;  %v627_v18 = vmax.bf16 (!%p174_p3), %v2734_v11, %v499_v7  ;;  %v308_v21 = vld [vmem:[%s4337_s0 + $0x210] sm:$0xff] (!%p174_p3)  ;;  %v309_v22 = vld [vmem:[%s4337_s0 + $0x218] sm:$0xff] (!%p174_p3)  ;;  %v246_v28 = vld [vmem:[%s4337_s0 + $0x20] sm:$0xff] (!%p174_p3) }
   0xb   : > { %v501_v20 = vadd.bf16 (!%p174_p3), %v373_v17, %v245_v15  ;;  %v436_v23 = vld [vmem:[%s4338_s1 + $0x210] sm:$0xff] (!%p174_p3)  ;;  %v437_v26 = vld [vmem:[%s4338_s1 + $0x218] sm:$0xff] (!%p174_p3)  ;;  %v247_v29 = vld [vmem:[%s4337_s0 + $0x28] sm:$0xff] (!%p174_p3)  ;;  %v628_v32 = vmax.bf16 (!%p174_p3), %v2734_v11, %v500_v19 }
   0xc   : > { %v690_v24 = vmax.bf16 (!%p174_p3), %v2734_v11, %v562_v13  ;;  %v691_v25 = vmax.bf16 (!%p174_p3), %v2734_v11, %v563_v14  ;;  %v564_v27 = vadd.bf16 (!%p174_p3), %v436_v23, %v308_v21  ;;  %v2458_v30 = vcombine.high (!%p174_p3), %v626_v12, %v627_v18  ;;  %v374_v34 = vld [vmem:[%s4338_s1 + $0x20] sm:$0xff] (!%p174_p3)  ;;  %v375_v35 = vld [vmem:[%s4338_s1 + $0x28] sm:$0xff] (!%p174_p3)  ;;  %v248_v48 = vld [vmem:[%s4337_s0 + $0x30] sm:$0xff] (!%p174_p3) }
   0xd   : > { %v2457_v31 = vcombine.low (!%p174_p3), %v626_v12, %v627_v18  ;;  %v629_v33 = vmax.bf16 (!%p174_p3), %v2734_v11, %v501_v20  ;;  %v310_v36 = vld [vmem:[%s4337_s0 + $0x220] sm:$0xff] (!%p174_p3)  ;;  %v565_v39 = vadd.bf16 (!%p174_p3), %v437_v26, %v309_v22  ;;  %v311_v41 = vld [vmem:[%s4337_s0 + $0x228] sm:$0xff] (!%p174_p3)  ;;  %v502_v46 = vadd.bf16 (!%p174_p3), %v374_v34, %v246_v28  ;;  %v249_v49 = vld [vmem:[%s4337_s0 + $0x38] sm:$0xff] (!%p174_p3) }
   0xe   : > { %v2522_v37 = vcombine.high %v690_v24, %v691_v25  ;;  %v2521_v38 = vcombine.low %v690_v24, %v691_v25  ;;  %v692_v40 = vmax.bf16 %v2734_v11, %v564_v27  ;;  %v438_v42 = vld [vmem:[%s4338_s1 + $0x220] sm:$0xff]  ;;  %v439_v43 = vld [vmem:[%s4338_s1 + $0x228] sm:$0xff]  ;;  %1778 = vmatprep.subr.bf16.mxu1 %v2458_v30  ;;  %v503_v47 = vadd.bf16 %v375_v35, %v247_v29  ;;  %v376_v50 = vld [vmem:[%s4338_s1 + $0x30] sm:$0xff]  ;;  %s4347_s4 = smov (!%p3160_p4, %s2387_s4), 31 }
   0xf   : > { %v2460_v44 = vcombine.high %v628_v32, %v629_v33  ;;  %v2459_v45 = vcombine.low %v628_v32, %v629_v33  ;;  %1779 = vmatpush1.bf16.msra.mxu1 %v2457_v31  ;;  %v693_v51 = vmax.bf16 %v2734_v11, %v565_v39  ;;  %v566_v52 = vadd.bf16 %v438_v42, %v310_v36  ;;  %v377_v54 = vld [vmem:[%s4338_s1 + $0x38] sm:$0xff]  ;;  %v312_v55 = vld [vmem:[%s4337_s0 + $0x230] sm:$0xff]  ;;  %v250_v62 = vld [vmem:[%s4337_s0 + $0x40] sm:$0xff]  ;;  %s2587_s9 = sshll.u32 %s4347_s4, 5  ;;  %s2588_s18 = sshll.u32 %s4347_s4, 4 }
  0x10   : > { %2004 = vmatprep.subr.bf16.mxu0 %v2522_v37  ;;  %v567_v53 = vadd.bf16 %v439_v43, %v311_v41  ;;  %v313_v56 = vld [vmem:[%s4337_s0 + $0x238] sm:$0xff]  ;;  %v630_v57 = vmax.bf16 %v2734_v11, %v502_v46  ;;  %v631_v58 = vmax.bf16 %v2734_v11, %v503_v47  ;;  %v504_v59 = vadd.bf16 %v376_v50, %v248_v48  ;;  %v440_v60 = vld [vmem:[%s4338_s1 + $0x230] sm:$0xff]  ;;  %v251_v3 = vld [vmem:[%s4337_s0 + $0x48] sm:$0xff]  ;;  %s3308_s5 = scalar_lea.vmem %s4339_s2, %s2587_s9  ;;  %s4278_s22 = scalar_lea.vmem %s4340_s3, %s2588_s18 }
  0x11   : > { %2005 = vmatpush1.bf16.msra.mxu0 %v2521_v38  ;;  %1780 = vmatprep.subr.bf16.mxu1 %v2460_v44  ;;  %v441_v61 = vld [vmem:[%s4338_s1 + $0x238] sm:$0xff]  ;;  %v2524_v63 = vcombine.high %v692_v40, %v693_v51  ;;  %v2523_v0 = vcombine.low %v692_v40, %v693_v51  ;;  %v694_v1 = vmax.bf16 %v2734_v11, %v566_v52  ;;  %v378_v4 = vld [vmem:[%s4338_s1 + $0x40] sm:$0xff]  ;;  %v379_v5 = vld [vmem:[%s4338_s1 + $0x48] sm:$0xff] }
  0x12   : > { %v695_v2 = vmax.bf16 %v2734_v11, %v567_v53  ;;  %v2462_v6 = vcombine.high %v630_v57, %v631_v58  ;;  %v2461_v7 = vcombine.low %v630_v57, %v631_v58  ;;  %v505_v8 = vadd.bf16 %v377_v54, %v249_v49  ;;  %v314_v10 = vld [vmem:[%s4337_s0 + $0x240] sm:$0xff]  ;;  %v315_v12 = vld [vmem:[%s4337_s0 + $0x248] sm:$0xff]  ;;  %v252_v18 = vld [vmem:[%s4337_s0 + $0x50] sm:$0xff] }
  0x13   : > { %v632_v9 = vmax.bf16 %v2734_v11, %v504_v59  ;;  %v442_v13 = vld [vmem:[%s4338_s1 + $0x240] sm:$0xff]  ;;  %2006 = vmatprep.subr.bf16.mxu0 %v2524_v63  ;;  %1781 = vmatpush1.bf16.msra.mxu1 %v2459_v45  ;;  %v568_v16 = vadd.bf16 %v440_v60, %v312_v55  ;;  %v443_v17 = vld [vmem:[%s4338_s1 + $0x248] sm:$0xff]  ;;  %v569_v20 = vadd.bf16 %v441_v61, %v313_v56  ;;  %v253_v22 = vld [vmem:[%s4337_s0 + $0x58] sm:$0xff] }
  0x14   : > { %v2526_v14 = vcombine.high %v694_v1, %v695_v2  ;;  %v2525_v15 = vcombine.low %v694_v1, %v695_v2  ;;  %1782 = vmatprep.subr.bf16.mxu1 %v2462_v6  ;;  %v633_v19 = vmax.bf16 %v2734_v11, %v505_v8  ;;  %v506_v21 = vadd.bf16 %v378_v4, %v250_v62  ;;  %v380_v23 = vld [vmem:[%s4338_s1 + $0x50] sm:$0xff]  ;;  %v381_v24 = vld [vmem:[%s4338_s1 + $0x58] sm:$0xff]  ;;  %v254_v37 = vld [vmem:[%s4337_s0 + $0x60] sm:$0xff] }
  0x15   : > { %2007 = vmatpush1.bf16.msra.mxu0 %v2523_v0  ;;  %v696_v25 = vmax.bf16 %v2734_v11, %v568_v16  ;;  %v507_v26 = vadd.bf16 %v379_v5, %v251_v3  ;;  %v570_v27 = vadd.bf16 %v442_v13, %v314_v10  ;;  %v571_v28 = vadd.bf16 %v443_v17, %v315_v12  ;;  %v316_v29 = vld [vmem:[%s4337_s0 + $0x250] sm:$0xff]  ;;  %v317_v30 = vld [vmem:[%s4337_s0 + $0x258] sm:$0xff]  ;;  %v255_v38 = vld [vmem:[%s4337_s0 + $0x68] sm:$0xff] }
  0x16   : > { %2008 = vmatprep.subr.bf16.mxu0 %v2526_v14  ;;  %v444_v31 = vld [vmem:[%s4338_s1 + $0x250] sm:$0xff]  ;;  %v2464_v32 = vcombine.high %v632_v9, %v633_v19  ;;  %v697_v33 = vmax.bf16 %v2734_v11, %v569_v20  ;;  %v2463_v34 = vcombine.low %v632_v9, %v633_v19  ;;  %v634_v35 = vmax.bf16 %v2734_v11, %v506_v21  ;;  %v445_v36 = vld [vmem:[%s4338_s1 + $0x258] sm:$0xff]  ;;  %v382_v43 = vld [vmem:[%s4338_s1 + $0x60] sm:$0xff] }
  0x17   : > { %1783 = vmatpush1.bf16.msra.mxu1 %v2461_v7  ;;  %v635_v39 = vmax.bf16 %v2734_v11, %v507_v26  ;;  %v2944_v40 = vmax.bf16 %v2734_v11, %v570_v27  ;;  %v699_v41 = vmax.bf16 %v2734_v11, %v571_v28  ;;  %v508_v42 = vadd.bf16 %v380_v23, %v252_v18  ;;  %v383_v44 = vld [vmem:[%s4338_s1 + $0x68] sm:$0xff]  ;;  %v318_v45 = vld [vmem:[%s4337_s0 + $0x260] sm:$0xff]  ;;  %v256_v60 = vld [vmem:[%s4337_s0 + $0x70] sm:$0xff] }
  0x18   : > { %1784 = vmatprep.subr.bf16.mxu1 %v2464_v32  ;;  %v2528_v46 = vcombine.high %v696_v25, %v697_v33  ;;  %v2527_v47 = vcombine.low %v696_v25, %v697_v33  ;;  %v509_v48 = vadd.bf16 %v381_v24, %v253_v22  ;;  %v319_v49 = vld [vmem:[%s4337_s0 + $0x268] sm:$0xff]  ;;  %v446_v50 = vld [vmem:[%s4338_s1 + $0x260] sm:$0xff]  ;;  %v572_v58 = vadd.bf16 %v444_v31, %v316_v29  ;;  %v257_v61 = vld [vmem:[%s4337_s0 + $0x78] sm:$0xff] }
  0x19   : > { %2009 = vmatpush1.bf16.msra.mxu0 %v2525_v15  ;;  %v447_v51 = vld [vmem:[%s4338_s1 + $0x268] sm:$0xff]  ;;  %v2466_v52 = vcombine.high %v634_v35, %v635_v39  ;;  %v2530_v53 = vcombine.high %v2944_v40, %v699_v41  ;;  %v2465_v54 = vcombine.low %v634_v35, %v635_v39  ;;  %v2529_v55 = vcombine.low %v2944_v40, %v699_v41  ;;  %v384_v2 = vld [vmem:[%s4338_s1 + $0x70] sm:$0xff]  ;;  %v385_v3 = vld [vmem:[%s4338_s1 + $0x78] sm:$0xff] }
  0x1a   : > { %2010 = vmatprep.subr.bf16.mxu0 %v2528_v46  ;;  %v2968_v56 = vmax.bf16 %v2734_v11, %v508_v42  ;;  %v637_v57 = vmax.bf16 %v2734_v11, %v509_v48  ;;  %v573_v59 = vadd.bf16 %v445_v36, %v317_v30  ;;  %v510_v62 = vadd.bf16 %v382_v43, %v254_v37  ;;  %v320_v4 = vld [vmem:[%s4337_s0 + $0x270] sm:$0xff]  ;;  %v321_v8 = vld [vmem:[%s4337_s0 + $0x278] sm:$0xff]  ;;  %v258_v12 = vld [vmem:[%s4337_s0 + $0x80] sm:$0xff] }
  0x1b   : > { %1785 = vmatpush1.bf16.msra.mxu1 %v2463_v34  ;;  %v511_v63 = vadd.bf16 %v383_v44, %v255_v38  ;;  %v574_v0 = vadd.bf16 %v446_v50, %v318_v45  ;;  %v575_v1 = vadd.bf16 %v447_v51, %v319_v49  ;;  %v700_v6 = vmax.bf16 %v2734_v11, %v572_v58  ;;  %v448_v9 = vld [vmem:[%s4338_s1 + $0x270] sm:$0xff]  ;;  %v449_v10 = vld [vmem:[%s4338_s1 + $0x278] sm:$0xff]  ;;  %v259_v16 = vld [vmem:[%s4337_s0 + $0x88] sm:$0xff] }
  0x1c   : > { %1786 = vmatprep.subr.bf16.mxu1 %v2466_v52  ;;  %v2468_v5 = vcombine.high %v2968_v56, %v637_v57  ;;  %v701_v7 = vmax.bf16 %v2734_v11, %v573_v59  ;;  %v3002_v13 = vmax.bf16 %v2734_v11, %v510_v62  ;;  %v386_v17 = vld [vmem:[%s4338_s1 + $0x80] sm:$0xff]  ;;  %v387_v18 = vld [vmem:[%s4338_s1 + $0x88] sm:$0xff]  ;;  %v512_v21 = vadd.bf16 %v384_v2, %v256_v60  ;;  %v260_v30 = vld [vmem:[%s4337_s0 + $0x90] sm:$0xff] }
  0x1d   : > { %2011 = vmatpush1.bf16.msra.mxu0 %v2527_v47  ;;  %v3005_v14 = vmax.bf16 %v2734_v11, %v511_v63  ;;  %v3008_v15 = vmax.bf16 %v2734_v11, %v574_v0  ;;  %v3020_v20 = vmax.bf16 %v2734_v11, %v575_v1  ;;  %v322_v22 = vld [vmem:[%s4337_s0 + $0x280] sm:$0xff]  ;;  %v323_v23 = vld [vmem:[%s4337_s0 + $0x288] sm:$0xff]  ;;  %v2467_v25 = vcombine.low %v2968_v56, %v637_v57  ;;  %v388_v31 = vld [vmem:[%s4338_s1 + $0x90] sm:$0xff] }
  0x1e   : > { %2012 = vmatprep.subr.bf16.mxu0 %v2530_v53  ;;  %v2532_v19 = vcombine.high %v700_v6, %v701_v7  ;;  %v450_v24 = vld [vmem:[%s4338_s1 + $0x280] sm:$0xff]  ;;  %v2531_v26 = vcombine.low %v700_v6, %v701_v7  ;;  %v513_v27 = vadd.bf16 %v385_v3, %v257_v61  ;;  %v576_v28 = vadd.bf16 %v448_v9, %v320_v4  ;;  %v451_v29 = vld [vmem:[%s4338_s1 + $0x288] sm:$0xff]  ;;  %v261_v39 = vld [vmem:[%s4337_s0 + $0x98] sm:$0xff] }
  0x1f   : > { %1787 = vmatpush1.bf16.msra.mxu1 %v2465_v54  ;;  %v2470_v32 = vcombine.high %v3002_v13, %v3005_v14  ;;  %v2534_v33 = vcombine.high %v3008_v15, %v3020_v20  ;;  %v3046_v34 = vmax.bf16 %v2734_v11, %v512_v21  ;;  %v577_v36 = vadd.bf16 %v449_v10, %v321_v8  ;;  %v389_v40 = vld [vmem:[%s4338_s1 + $0x98] sm:$0xff]  ;;  %v324_v45 = vld [vmem:[%s4337_s0 + $0x290] sm:$0xff]  ;;  %v262_v52 = vld [vmem:[%s4337_s0 + $0xa0] sm:$0xff] }
  0x20   : > { %1788 = vmatprep.subr.bf16.mxu1 %v2468_v5  ;;  %v3049_v35 = vmax.bf16 %v2734_v11, %v513_v27  ;;  %v3052_v37 = vmax.bf16 %v2734_v11, %v576_v28  ;;  %v514_v38 = vadd.bf16 %v386_v17, %v258_v12  ;;  %v515_v41 = vadd.bf16 %v387_v18, %v259_v16  ;;  %v325_v46 = vld [vmem:[%s4337_s0 + $0x298] sm:$0xff]  ;;  %v452_v47 = vld [vmem:[%s4338_s1 + $0x290] sm:$0xff]  ;;  %v263_v53 = vld [vmem:[%s4337_s0 + $0xa8] sm:$0xff] }
  0x21   : > { %2013 = vmatpush1.bf16.msra.mxu0 %v2529_v55  ;;  %v578_v42 = vadd.bf16 %v450_v24, %v322_v22  ;;  %v579_v43 = vadd.bf16 %v451_v29, %v323_v23  ;;  %v516_v44 = vadd.bf16 %v388_v31, %v260_v30  ;;  %v2469_v48 = vcombine.low %v3002_v13, %v3005_v14  ;;  %v453_v51 = vld [vmem:[%s4338_s1 + $0x298] sm:$0xff]  ;;  %v390_v57 = vld [vmem:[%s4338_s1 + $0xa0] sm:$0xff]  ;;  %v391_v58 = vld [vmem:[%s4338_s1 + $0xa8] sm:$0xff] }
  0x22   : > { %2014 = vmatprep.subr.bf16.mxu0 %v2532_v19  ;;  %v705_v49 = vmax.bf16 %v2734_v11, %v577_v36  ;;  %v3073_v50 = vmax.bf16 %v2734_v11, %v514_v38  ;;  %v2533_v54 = vcombine.low %v3008_v15, %v3020_v20  ;;  %v2472_v55 = vcombine.high %v3046_v34, %v3049_v35  ;;  %v326_v59 = vld [vmem:[%s4337_s0 + $0x2a0] sm:$0xff]  ;;  %v327_v0 = vld [vmem:[%s4337_s0 + $0x2a8] sm:$0xff]  ;;  %v264_v15 = vld [vmem:[%s4337_s0 + $0xb0] sm:$0xff] }
  0x23   : > { %1789 = vmatpush1.bf16.msra.mxu1 %v2467_v25  ;;  %v3089_v56 = vmax.bf16 %v2734_v11, %v515_v41  ;;  %v3102_v61 = vmax.bf16 %v2734_v11, %v578_v42  ;;  %v3105_v62 = vmax.bf16 %v2734_v11, %v579_v43  ;;  %v517_v63 = vadd.bf16 %v389_v40, %v261_v39  ;;  %v454_v1 = vld [vmem:[%s4338_s1 + $0x2a0] sm:$0xff]  ;;  %v455_v2 = vld [vmem:[%s4338_s1 + $0x2a8] sm:$0xff]  ;;  %v265_v19 = vld [vmem:[%s4337_s0 + $0xb8] sm:$0xff] }
  0x24   : > { %1790 = vmatprep.subr.bf16.mxu1 %v2470_v32  ;;  %v2536_v60 = vcombine.high %v3052_v37, %v705_v49  ;;  %v2471_v3 = vcombine.low %v3046_v34, %v3049_v35  ;;  %v2535_v4 = vcombine.low %v3052_v37, %v705_v49  ;;  %v3122_v6 = vmax.bf16 %v2734_v11, %v516_v44  ;;  %v392_v20 = vld [vmem:[%s4338_s1 + $0xb0] sm:$0xff]  ;;  %v393_v21 = vld [vmem:[%s4338_s1 + $0xb8] sm:$0xff]  ;;  %v266_v32 = vld [vmem:[%s4337_s0 + $0xc0] sm:$0xff] }
  0x25   : > { %2015 = vmatpush1.bf16.msra.mxu0 %v2531_v26  ;;  %v2474_v5 = vcombine.high %v3073_v50, %v3089_v56  ;;  %v3125_v7 = vmax.bf16 %v2734_v11, %v517_v63  ;;  %v580_v8 = vadd.bf16 %v452_v47, %v324_v45  ;;  %v581_v9 = vadd.bf16 %v453_v51, %v325_v46  ;;  %v328_v24 = vld [vmem:[%s4337_s0 + $0x2b0] sm:$0xff]  ;;  %v329_v30 = vld [vmem:[%s4337_s0 + $0x2b8] sm:$0xff]  ;;  %v267_v36 = vld [vmem:[%s4337_s0 + $0xc8] sm:$0xff] }
  0x26   : > { %2016 = vmatprep.subr.bf16.mxu0 %v2534_v33  ;;  %v518_v10 = vadd.bf16 %v390_v57, %v262_v52  ;;  %v519_v12 = vadd.bf16 %v391_v58, %v263_v53  ;;  %v582_v13 = vadd.bf16 %v454_v1, %v326_v59  ;;  %v583_v14 = vadd.bf16 %v455_v2, %v327_v0  ;;  %v456_v25 = vld [vmem:[%s4338_s1 + $0x2b0] sm:$0xff]  ;;  %v457_v31 = vld [vmem:[%s4338_s1 + $0x2b8] sm:$0xff]  ;;  %v394_v37 = vld [vmem:[%s4338_s1 + $0xc0] sm:$0xff] }
  0x27   : > { %1791 = vmatpush1.bf16.msra.mxu1 %v2469_v48  ;;  %v2538_v16 = vcombine.high %v3102_v61, %v3105_v62  ;;  %v3134_v17 = vmax.bf16 %v2734_v11, %v580_v8  ;;  %v3137_v18 = vmax.bf16 %v2734_v11, %v581_v9  ;;  %v2473_v22 = vcombine.low %v3073_v50, %v3089_v56  ;;  %v395_v38 = vld [vmem:[%s4338_s1 + $0xc8] sm:$0xff]  ;;  %v330_v41 = vld [vmem:[%s4337_s0 + $0x2c0] sm:$0xff]  ;;  %v268_v47 = vld [vmem:[%s4337_s0 + $0xd0] sm:$0xff] }
  0x28   : > { %1792 = vmatprep.subr.bf16.mxu1 %v2472_v55  ;;  %v2537_v23 = vcombine.low %v3102_v61, %v3105_v62  ;;  %v2476_v26 = vcombine.high %v3122_v6, %v3125_v7  ;;  %v3167_v27 = vmax.bf16 %v2734_v11, %v518_v10  ;;  %v3170_v28 = vmax.bf16 %v2734_v11, %v519_v12  ;;  %v331_v42 = vld [vmem:[%s4337_s0 + $0x2c8] sm:$0xff]  ;;  %v458_v45 = vld [vmem:[%s4338_s1 + $0x2c0] sm:$0xff]  ;;  %v269_v52 = vld [vmem:[%s4337_s0 + $0xd8] sm:$0xff] }
  0x29   : > { %2017 = vmatpush1.bf16.msra.mxu0 %v2533_v54  ;;  %v3173_v29 = vmax.bf16 %v2734_v11, %v582_v13  ;;  %v3185_v33 = vmax.bf16 %v2734_v11, %v583_v14  ;;  %v520_v34 = vadd.bf16 %v392_v20, %v264_v15  ;;  %v521_v35 = vadd.bf16 %v393_v21, %v265_v19  ;;  %v459_v46 = vld [vmem:[%s4338_s1 + $0x2c8] sm:$0xff]  ;;  %v396_v53 = vld [vmem:[%s4338_s1 + $0xd0] sm:$0xff]  ;;  %v397_v54 = vld [vmem:[%s4338_s1 + $0xd8] sm:$0xff] }
  0x2a   : > { %2018 = vmatprep.subr.bf16.mxu0 %v2536_v60  ;;  %v2540_v39 = vcombine.high %v3134_v17, %v3137_v18  ;;  %v584_v40 = vadd.bf16 %v456_v25, %v328_v24  ;;  %v2475_v43 = vcombine.low %v3122_v6, %v3125_v7  ;;  %v585_v44 = vadd.bf16 %v457_v31, %v329_v30  ;;  %v332_v58 = vld [vmem:[%s4337_s0 + $0x2d0] sm:$0xff]  ;;  %v333_v63 = vld [vmem:[%s4337_s0 + $0x2d8] sm:$0xff]  ;;  %v270_v8 = vld [vmem:[%s4337_s0 + $0xe0] sm:$0xff] }
  0x2b   : > { %1793 = vmatpush1.bf16.msra.mxu1 %v2471_v3  ;;  %v2539_v48 = vcombine.low %v3134_v17, %v3137_v18  ;;  %v2478_v49 = vcombine.high %v3167_v27, %v3170_v28  ;;  %v522_v50 = vadd.bf16 %v394_v37, %v266_v32  ;;  %v523_v51 = vadd.bf16 %v395_v38, %v267_v36  ;;  %v460_v0 = vld [vmem:[%s4338_s1 + $0x2d0] sm:$0xff]  ;;  %v461_v1 = vld [vmem:[%s4338_s1 + $0x2d8] sm:$0xff]  ;;  %v271_v9 = vld [vmem:[%s4337_s0 + $0xe8] sm:$0xff] }
  0x2c   : > { %1794 = vmatprep.subr.bf16.mxu1 %v2474_v5  ;;  %v2542_v55 = vcombine.high %v3173_v29, %v3185_v33  ;;  %v3237_v56 = vmax.bf16 %v2734_v11, %v520_v34  ;;  %v3240_v57 = vmax.bf16 %v2734_v11, %v521_v35  ;;  %v3246_v59 = vmax.bf16 %v2734_v11, %v584_v40  ;;  %v398_v10 = vld [vmem:[%s4338_s1 + $0xe0] sm:$0xff]  ;;  %v399_v15 = vld [vmem:[%s4338_s1 + $0xe8] sm:$0xff]  ;;  %v272_v31 = vld [vmem:[%s4337_s0 + $0xf0] sm:$0xff] }
  0x2d   : > { %2019 = vmatpush1.bf16.msra.mxu0 %v2535_v4  ;;  %v3249_v60 = vmax.bf16 %v2734_v11, %v585_v44  ;;  %v586_v61 = vadd.bf16 %v458_v45, %v330_v41  ;;  %v587_v62 = vadd.bf16 %v459_v46, %v331_v42  ;;  %v524_v2 = vadd.bf16 %v396_v53, %v268_v47  ;;  %v462_v17 = vld [vmem:[%s4338_s1 + $0x2e0] sm:$0xff]  ;;  %v335_v21 = vld [vmem:[%s4337_s0 + $0x2e8] sm:$0xff]  ;;  %v273_v32 = vld [vmem:[%s4337_s0 + $0xf8] sm:$0xff] }
  0x2e   : > { %2020 = vmatprep.subr.bf16.mxu0 %v2538_v16  ;;  %v525_v3 = vadd.bf16 %v397_v54, %v269_v52  ;;  %v2477_v4 = vcombine.low %v3167_v27, %v3170_v28  ;;  %v2541_v5 = vcombine.low %v3173_v29, %v3185_v33  ;;  %v3266_v6 = vmax.bf16 %v2734_v11, %v522_v50  ;;  %v334_v16 = vld [vmem:[%s4337_s0 + $0x2e0] sm:$0xff]  ;;  %v400_v33 = vld [vmem:[%s4338_s1 + $0xf0] sm:$0xff]  ;;  %v401_v37 = vld [vmem:[%s4338_s1 + $0xf8] sm:$0xff] }
  0x2f   : > { %1795 = vmatpush1.bf16.msra.mxu1 %v2473_v22  ;;  %v3269_v7 = vmax.bf16 %v2734_v11, %v523_v51  ;;  %v2480_v12 = vcombine.high %v3237_v56, %v3240_v57  ;;  %v588_v13 = vadd.bf16 %v460_v0, %v332_v58  ;;  %v589_v14 = vadd.bf16 %v461_v1, %v333_v63  ;;  %v463_v22 = vld [vmem:[%s4338_s1 + $0x2e8] sm:$0xff]  ;;  %v3341_v38 = vld [vmem:[%s3308_s5] sm:$0xff]  ;;  %v336_v41 = vld [vmem:[%s4337_s0 + $0x2f0] sm:$0xff] }
  0x30   : > { %1796 = vmatprep.subr.bf16.mxu1 %v2476_v26  ;;  %v2544_v18 = vcombine.high %v3246_v59, %v3249_v60  ;;  %v3294_v19 = vmax.bf16 %v2734_v11, %v586_v61  ;;  %v3297_v20 = vmax.bf16 %v2734_v11, %v587_v62  ;;  %v3313_v24 = vmax.bf16 %v2734_v11, %v524_v2  ;;  %v337_v42 = vld [vmem:[%s4337_s0 + $0x2f8] sm:$0xff]  ;;  %v3373_v50 = vld [vmem:[%s3308_s5 + $0x30] sm:$0xff]  ;;  %v403_v61 = vld [vmem:[%s4338_s1 + $0x108] sm:$0xff] }
  0x31   : > { %2021 = vmatpush1.bf16.msra.mxu0 %v2537_v23  ;;  %v2479_v23 = vcombine.low %v3237_v56, %v3240_v57  ;;  %v3316_v25 = vmax.bf16 %v2734_v11, %v525_v3  ;;  %v526_v26 = vadd.bf16 %v398_v10, %v270_v8  ;;  %v2543_v27 = vcombine.low %v3246_v59, %v3249_v60  ;;  %v275_v59 = vld [vmem:[%s4337_s0 + $0x108] sm:$0xff]  ;;  %v402_v60 = vld [vmem:[%s4338_s1 + $0x100] sm:$0xff]  ;;  %v277_v8 = vld [vmem:[%s4337_s0 + $0x118] sm:$0xff] }
  0x32   : > { %2022 = vmatprep.subr.bf16.mxu0 %v2540_v39  ;;  %v2482_v28 = vcombine.high %v3266_v6, %v3269_v7  ;;  %v527_v29 = vadd.bf16 %v399_v15, %v271_v9  ;;  %v590_v30 = vadd.bf16 %v462_v17, %v334_v16  ;;  %v3332_v34 = vmax.bf16 %v2734_v11, %v588_v13  ;;  %v3344_v39 = vld [vmem:[%s3308_s5 + $0x20] sm:$0xff]  ;;  %v339_v2 = vld [vmem:[%s4337_s0 + $0x308] sm:$0xff]  ;;  %v404_v13 = vld [vmem:[%s4338_s1 + $0x110] sm:$0xff] }
  0x33   : > { %1797 = vmatpush1.bf16.msra.mxu1 %v2475_v43  ;;  %v3335_v35 = vmax.bf16 %v2734_v11, %v589_v14  ;;  %v591_v36 = vadd.bf16 %v463_v22, %v335_v21  ;;  %v2546_v40 = vcombine.high %v3294_v19, %v3297_v20  ;;  %v464_v43 = vld [vmem:[%s4338_s1 + $0x2f0] sm:$0xff]  ;;  %v2481_v44 = vcombine.low %v3266_v6, %v3269_v7  ;;  %v338_v1 = vld [vmem:[%s4337_s0 + $0x300] sm:$0xff]  ;;  %v467_v6 = vld [vmem:[%s4338_s1 + $0x308] sm:$0xff] }
  0x34   : > { %1798 = vmatprep.subr.bf16.mxu1 %v2478_v49  ;;  %v2545_v45 = vcombine.low %v3294_v19, %v3297_v20  ;;  %v2484_v46 = vcombine.high %v3313_v24, %v3316_v25  ;;  %v3364_v47 = vmax.bf16 %v2734_v11, %v526_v26  ;;  %v3370_v49 = vld [vmem:[%s3308_s5 + $0x10] sm:$0xff]  ;;  %v3376_v51 = vmax.bf16 %v2734_v11, %v527_v29  ;;  %v466_v3 = vld [vmem:[%s4338_s1 + $0x300] sm:$0xff]  ;;  %v405_v14 = vld [vmem:[%s4338_s1 + $0x118] sm:$0xff] }
  0x35   : > { %2023 = vmatpush1.bf16.msra.mxu0 %v2539_v48  ;;  %v465_v48 = vld [vmem:[%s4338_s1 + $0x2f8] sm:$0xff]  ;;  %v528_v52 = vadd.bf16 %v400_v33, %v272_v31  ;;  %v529_v53 = vadd.bf16 %v401_v37, %v273_v32  ;;  %v2394_v54 = vcombine.high %v3341_v38, %v3344_v39  ;;  %v2548_v56 = vcombine.high %v3332_v34, %v3335_v35  ;;  %v276_v7 = vld [vmem:[%s4337_s0 + $0x110] sm:$0xff] }
  0x36   : > { %2024 = vmatprep.subr.bf16.mxu0 %v2542_v55  ;;  %v274_v55 = vld [vmem:[%s4337_s0 + $0x100] sm:$0xff]  ;;  %v3386_v57 = vmax.bf16 %v2734_v11, %v590_v30  ;;  %v3389_v58 = vmax.bf16 %v2734_v11, %v591_v36  ;;  %v592_v62 = vadd.bf16 %v464_v43, %v336_v41  ;;  %v593_v63 = vadd.bf16 %v465_v48, %v337_v42  ;;  %v340_v15 = vld [vmem:[%s4337_s0 + $0x310] sm:$0xff]  ;;  %v341_v19 = vld [vmem:[%s4337_s0 + $0x318] sm:$0xff] }
  0x37   : > { %1799 = vmatpush1.bf16.msra.mxu1 %v2477_v4  ;;  %1810 = vmatprep.mubr.bf16.mxu1 %v2394_v54  ;;  %v2398_v0 = vcombine.high %v3370_v49, %v3373_v50  ;;  %v2483_v4 = vcombine.low %v3313_v24, %v3316_v25  ;;  %v2486_v9 = vcombine.high %v3364_v47, %v3376_v51  ;;  %v468_v20 = vld [vmem:[%s4338_s1 + $0x310] sm:$0xff]  ;;  %v469_v21 = vld [vmem:[%s4338_s1 + $0x318] sm:$0xff]  ;;  %v279_v36 = vld [vmem:[%s4337_s0 + $0x128] sm:$0xff] }
  0x38   : > { %1800 = vmatprep.subr.bf16.mxu1 %v2480_v12  ;;  %v3427_v10 = vmax.bf16 %v2734_v11, %v528_v52  ;;  %v3430_v12 = vmax.bf16 %v2734_v11, %v529_v53  ;;  %v2550_v16 = vcombine.high %v3386_v57, %v3389_v58  ;;  %v530_v17 = vadd.bf16 %v402_v60, %v274_v55  ;;  %v3485_v42 = vld [vmem:[%s3308_s5 + $0x40] sm:$0xff]  ;;  %v471_v53 = vld [vmem:[%s4338_s1 + $0x328] sm:$0xff]  ;;  %v280_v60 = vld [vmem:[%s4337_s0 + $0x130] sm:$0xff] }
  0x39   : > { %2025 = vmatpush1.bf16.msra.mxu0 %v2541_v5  ;;  %v2547_v5 = vcombine.low %v3332_v34, %v3335_v35  ;;  %2036 = vmatprep.mubr.bf16.mxu0 %v2398_v0  ;;  %v3453_v22 = vmax.bf16 %v2734_v11, %v592_v62  ;;  %v594_v24 = vadd.bf16 %v466_v3, %v338_v1  ;;  %v278_v35 = vld [vmem:[%s4337_s0 + $0x120] sm:$0xff]  ;;  %v281_v0 = vld [vmem:[%s4337_s0 + $0x138] sm:$0xff]  ;;  %v408_v1 = vld [vmem:[%s4338_s1 + $0x130] sm:$0xff] }
  0x3a   : > { %2026 = vmatprep.subr.bf16.mxu0 %v2544_v18  ;;  %v531_v18 = vadd.bf16 %v403_v61, %v275_v59  ;;  %v595_v25 = vadd.bf16 %v467_v6, %v339_v2  ;;  %v2485_v26 = vcombine.low %v3364_v47, %v3376_v51  ;;  %v533_v29 = vadd.bf16 %v405_v14, %v277_v8  ;;  %v3488_v43 = vld [vmem:[%s3308_s5 + $0x60] sm:$0xff]  ;;  %v343_v51 = vld [vmem:[%s4337_s0 + $0x328] sm:$0xff]  ;;  %v3528_v59 = vld [vmem:[%s3308_s5 + $0x70] sm:$0xff] }
  0x3b   : > { %1801 = vmatpush1.bf16.msra.mxu1 %v2479_v23  ;;  %v3456_v23 = vmax.bf16 %v2734_v11, %v593_v63  ;;  %v596_v30 = vadd.bf16 %v468_v20, %v340_v15  ;;  %v597_v31 = vadd.bf16 %v469_v21, %v341_v19  ;;  %v2488_v32 = vcombine.high %v3427_v10, %v3430_v12  ;;  %v470_v52 = vld [vmem:[%s4338_s1 + $0x320] sm:$0xff]  ;;  %v409_v2 = vld [vmem:[%s4338_s1 + $0x138] sm:$0xff]  ;;  %v411_v19 = vld [vmem:[%s4338_s1 + $0x148] sm:$0xff] }
  0x3c   : > { %1802 = vmatprep.subr.bf16.mxu1 %v2482_v28  ;;  %v532_v28 = vadd.bf16 %v404_v13, %v276_v7  ;;  %v3465_v33 = vmax.bf16 %v2734_v11, %v530_v17  ;;  %v3468_v34 = vmax.bf16 %v2734_v11, %v531_v18  ;;  %v3482_v41 = vmax.bf16 %v2734_v11, %v595_v25  ;;  %v344_v7 = vld [vmem:[%s4337_s0 + $0x330] sm:$0xff]  ;;  %v345_v8 = vld [vmem:[%s4337_s0 + $0x338] sm:$0xff]  ;;  %v282_v14 = vld [vmem:[%s4337_s0 + $0x140] sm:$0xff] }
  0x3d   : > { %2027 = vmatpush1.bf16.msra.mxu0 %v2543_v27  ;;  %v2549_v27 = vcombine.low %v3386_v57, %v3389_v58  ;;  %v2552_v37 = vcombine.high %v3453_v22, %v3456_v23  ;;  %v2487_v47 = vcombine.low %v3427_v10, %v3430_v12  ;;  %v2551_v48 = vcombine.low %v3453_v22, %v3456_v23  ;;  %v3525_v58 = vld [vmem:[%s3308_s5 + $0x50] sm:$0xff]  ;;  %v473_v13 = vld [vmem:[%s4338_s1 + $0x338] sm:$0xff]  ;;  %v410_v18 = vld [vmem:[%s4338_s1 + $0x140] sm:$0xff] }
  0x3e   : > { %2028 = vmatprep.subr.bf16.mxu0 %v2546_v40  ;;  %v3479_v40 = vmax.bf16 %v2734_v11, %v594_v24  ;;  %v3513_v54 = vmax.bf16 %v2734_v11, %v532_v28  ;;  %v3516_v55 = vmax.bf16 %v2734_v11, %v533_v29  ;;  %v3522_v57 = vmax.bf16 %v2734_v11, %v597_v31  ;;  %v346_v20 = vld [vmem:[%s4337_s0 + $0x340] sm:$0xff]  ;;  %v347_v24 = vld [vmem:[%s4337_s0 + $0x348] sm:$0xff] }
  0x3f   : > { %1803 = vmatpush1.bf16.msra.mxu1 %v2481_v44  ;;  %v406_v44 = vld [vmem:[%s4338_s1 + $0x120] sm:$0xff]  ;;  %v2490_v61 = vcombine.high %v3465_v33, %v3468_v34  ;;  %v2393_v3 = vcombine.low %v3341_v38, %v3344_v39  ;;  %v599_v6 = vadd.bf16 %v471_v53, %v343_v51  ;;  %v2397_v38 = vcombine.low %v3370_v49, %v3373_v50  ;;  %v283_v49 = vld [vmem:[%s4337_s0 + $0x148] sm:$0xff]  ;;  %v348_v53 = vld [vmem:[%s4337_s0 + $0x350] sm:$0xff] }
  0x40   : > { %1804 = vmatprep.subr.bf16.mxu1 %v2484_v46  ;;  %v342_v46 = vld [vmem:[%s4337_s0 + $0x320] sm:$0xff]  ;;  %v534_v62 = vadd.bf16 %v406_v44, %v278_v35  ;;  %v2489_v39 = vcombine.low %v3465_v33, %v3468_v34  ;;  %v2553_v10 = vcombine.low %v3479_v40, %v3482_v41  ;;  %v2402_v12 = vcombine.high %v3485_v42, %v3488_v43  ;;  %v285_v44 = vld [vmem:[%s4337_s0 + $0x158] sm:$0xff] }
  0x41   : > { %2029 = vmatpush1.bf16.msra.mxu0 %v2545_v45  ;;  %v407_v45 = vld [vmem:[%s4338_s1 + $0x128] sm:$0xff]  ;;  %v2492_v50 = vcombine.high %v3513_v54, %v3516_v55  ;;  %v536_v17 = vadd.bf16 %v408_v1, %v280_v60  ;;  %v537_v23 = vadd.bf16 %v409_v2, %v281_v0  ;;  %v474_v25 = vld [vmem:[%s4338_s1 + $0x340] sm:$0xff]  ;;  %v3608_v28 = vmax.bf16 %v2734_v11, %v599_v6 }
  0x42   : > { %2030 = vmatprep.subr.bf16.mxu0 %v2548_v56  ;;  %v3519_v56 = vmax.bf16 %v2734_v11, %v596_v30  ;;  %v535_v63 = vadd.bf16 %v407_v45, %v279_v36  ;;  %v3590_v21 = vmax.bf16 %v2734_v11, %v534_v62  ;;  %v601_v30 = vadd.bf16 %v473_v13, %v345_v8  ;;  %v412_v45 = vld [vmem:[%s4338_s1 + $0x150] sm:$0xff]  ;;  %v349_v62 = vld [vmem:[%s4337_s0 + $0x358] sm:$0xff]  ;;  %v287_v8 = vld [vmem:[%s4337_s0 + $0x168] sm:$0xff] }
  0x43   : > { %1805 = vmatpush1.bf16.msra.mxu1 %v2483_v4  ;;  %v2554_v4 = vcombine.high %v3479_v40, %v3482_v41  ;;  %v2491_v31 = vcombine.low %v3513_v54, %v3516_v55  ;;  %v538_v33 = vadd.bf16 %v410_v18, %v282_v14  ;;  %v539_v34 = vadd.bf16 %v411_v19, %v283_v49  ;;  %v3619_v40 = vld [vmem:[%s4337_s0 + $0x150] sm:$0xff]  ;;  %v350_v14 = vld [vmem:[%s4337_s0 + $0x360] sm:$0xff]  ;;  %v351_v49 = vld [vmem:[%s4337_s0 + $0x368] sm:$0xff] }
  0x44   : > { %1806 = vmatprep.subr.bf16.mxu1 %v2486_v9  ;;  %v472_v9 = vld [vmem:[%s4338_s1 + $0x330] sm:$0xff]  ;;  %v2556_v15 = vcombine.high %v3519_v56, %v3522_v57  ;;  %v3593_v22 = vmax.bf16 %v2734_v11, %v535_v63  ;;  %v2555_v35 = vcombine.low %v3519_v56, %v3522_v57  ;;  %v602_v36 = vadd.bf16 %v474_v25, %v346_v20  ;;  %v3660_v57 = vld [vmem:[%s3308_s5 + $0xa0] sm:$0xff]  ;;  %v477_v63 = vld [vmem:[%s4338_s1 + $0x358] sm:$0xff] }
  0x45   : > { %2031 = vmatpush1.bf16.msra.mxu0 %v2547_v5  ;;  %v598_v5 = vadd.bf16 %v470_v52, %v342_v46  ;;  %v600_v29 = vadd.bf16 %v472_v9, %v344_v7  ;;  %v413_v46 = vld [vmem:[%s4338_s1 + $0x158] sm:$0xff]  ;;  %v3644_v51 = vmax.bf16 %v2734_v11, %v601_v30  ;;  %v3647_v52 = vld [vmem:[%s3308_s5 + $0x80] sm:$0xff]  ;;  %v476_v54 = vld [vmem:[%s4338_s1 + $0x350] sm:$0xff]  ;;  %v2405_v55 = vcombine.low %v3525_v58, %v3528_v59 }
  0x46   : > { %2032 = vmatprep.subr.bf16.mxu0 %v2550_v16  ;;  %v2406_v16 = vcombine.high %v3525_v58, %v3528_v59  ;;  %v2494_v41 = vcombine.high %v3590_v21, %v3593_v22  ;;  %v2493_v56 = vcombine.low %v3590_v21, %v3593_v22  ;;  %v3663_v60 = vmax.bf16 %v2734_v11, %v538_v33  ;;  %v3675_v58 = vld [vmem:[%s3308_s5 + $0x90] sm:$0xff]  ;;  %v414_v9 = vld [vmem:[%s4338_s1 + $0x160] sm:$0xff]  ;;  %v479_v21 = vld [vmem:[%s4338_s1 + $0x368] sm:$0xff] }
  0x47   : > { %1807 = vmatpush1.bf16.msra.mxu1 %v2485_v26  ;;  %v475_v26 = vld [vmem:[%s4338_s1 + $0x348] sm:$0xff]  ;;  %v3678_v59 = vld [vmem:[%s3308_s5 + $0xb0] sm:$0xff]  ;;  %v3681_v0 = vmax.bf16 %v2734_v11, %v602_v36  ;;  %v540_v2 = vadd.bf16 %v412_v45, %v3619_v40  ;;  %v604_v7 = vadd.bf16 %v476_v54, %v348_v53  ;;  %v605_v13 = vadd.bf16 %v477_v63, %v349_v62  ;;  %v3729_v19 = vld [vmem:[%s3308_s5 + $0xc0] sm:$0xff] }
  0x48   : > { %1808 = vmatprep.subr.bf16.mxu1 %v2488_v32  ;;  %v2401_v32 = vcombine.low %v3485_v42, %v3488_v43  ;;  %v3624_v42 = vmax.bf16 %v2734_v11, %v536_v17  ;;  %v3627_v43 = vmax.bf16 %v2734_v11, %v537_v23  ;;  %v2409_v17 = vcombine.low %v3647_v52, %v3660_v57  ;;  %v3732_v20 = vld [vmem:[%s3308_s5 + $0xe0] sm:$0xff]  ;;  %v288_v22 = vld [vmem:[%s4337_s0 + $0x170] sm:$0xff]  ;;  %v289_v23 = vld [vmem:[%s4337_s0 + $0x178] sm:$0xff] }
  0x49   : > { %2033 = vmatpush1.bf16.msra.mxu0 %v2549_v27  ;;  %v3605_v27 = vmax.bf16 %v2734_v11, %v598_v5  ;;  %v3746_v25 = vmax.bf16 %v2734_v11, %v540_v2  ;;  %v3761_v30 = vmax.bf16 %v2734_v11, %v604_v7  ;;  %v353_v33 = vld [vmem:[%s4337_s0 + $0x378] sm:$0xff]  ;;  %v3774_v36 = vmax.bf16 %v2734_v11, %v605_v13  ;;  %v483_v7 = vld [vmem:[%s4338_s1 + $0x388] sm:$0xff] }
  0x4a   : > { %2034 = vmatprep.subr.bf16.mxu0 %v2552_v37  ;;  %v603_v37 = vadd.bf16 %v475_v26, %v347_v24  ;;  %v2496_v6 = vcombine.high %v3624_v42, %v3627_v43  ;;  %v607_v40 = vadd.bf16 %v479_v21, %v351_v49  ;;  %v2417_v2 = vcombine.low %v3729_v19, %v3732_v20 }
  0x4b   : > { %1809 = vmatpush1.bf16.msra.mxu1 %v2487_v47  ;;  %v2558_v47 = vcombine.high %v3605_v27, %v3608_v28  ;;  %v2557_v5 = vcombine.low %v3605_v27, %v3608_v28  ;;  %v416_v27 = vld [vmem:[%s4338_s1 + $0x170] sm:$0xff]  ;;  %v417_v28 = vld [vmem:[%s4338_s1 + $0x178] sm:$0xff]  ;;  %v2563_v13 = vcombine.low %v3761_v30, %v3774_v36 }
  0x4c   : > { %1891 = vmatprep.subr.bf16.mxu1 %v2490_v61  ;;  %v3666_v61 = vmax.bf16 %v2734_v11, %v539_v34  ;;  %v3684_v1 = vmax.bf16 %v2734_v11, %v603_v37  ;;  %v480_v34 = vld [vmem:[%s4338_s1 + $0x370] sm:$0xff]  ;;  %v3812_v63 = vmax.bf16 %v2734_v11, %v607_v40  ;;  %v358_v40 = vld [vmem:[%s4337_s0 + $0x3a0] sm:$0xff] }
  0x4d   : > { %2035 = vmatpush1.bf16.msra.mxu0 %v2551_v48  ;;  %v3641_v48 = vmax.bf16 %v2734_v11, %v600_v29  ;;  %v352_v29 = vld [vmem:[%s4337_s0 + $0x370] sm:$0xff] }
  0x4e   : > { %2117 = vmatprep.subr.bf16.mxu0 %v2554_v4  ;;  %1811 = vmatmul.mubr.bf16.vlgmr.msra.gmra.mrb[0].mxu1 %v2393_v3  ;;  %v541_v3 = vadd.bf16 %v413_v46, %v285_v44  ;;  %v3690_v4 = vld [vmem:[%s4337_s0 + $0x160] sm:$0xff]  ;;  %v2498_v18 = vcombine.high %v3663_v60, %v3666_v61  ;;  %v2562_v24 = vcombine.high %v3681_v0, %v3684_v1 }
  0x4f   : > { %1892 = vmatpush1.bf16.msra.mxu1 %v2489_v39  ;;  %1820 = vmatprep.mubr.bf16.mxu1 %v2402_v12  ;;  %v2560_v39 = vcombine.high %v3641_v48, %v3644_v51  ;;  %v2410_v12 = vcombine.high %v3647_v52, %v3660_v57  ;;  %v545_v44 = vadd.bf16 %v417_v28, %v289_v23  ;;  %v418_v57 = vld [vmem:[%s4338_s1 + $0x180] sm:$0xff]  ;;  %v357_v23 = vld [vmem:[%s4337_s0 + $0x398] sm:$0xff] }
  0x50   : > { %2037 = vmatmul.mubr.bf16.vlgmr.msra.gmra.mrb[0].mxu0 %v2397_v38  ;;  %1893 = vmatprep.subr.bf16.mxu1 %v2492_v50  ;;  %v415_v38 = vld [vmem:[%s4338_s1 + $0x168] sm:$0xff]  ;;  %v478_v50 = vld [vmem:[%s4338_s1 + $0x360] sm:$0xff]  ;;  %v3749_v26 = vmax.bf16 %v2734_v11, %v541_v3  ;;  %v2561_v45 = vcombine.low %v3681_v0, %v3684_v1  ;;  %v2418_v46 = vcombine.high %v3729_v19, %v3732_v20  ;;  %v3878_v19 = vld [vmem:[%s3308_s5 + $0x130] sm:$0xff] }
  0x51   : > { %2118 = vmatpush1.bf16.msra.mxu0 %v2553_v10  ;;  %2046 = vmatprep.mubr.bf16.mxu0 %v2406_v16  ;;  %v2495_v10 = vcombine.low %v3624_v42, %v3627_v43  ;;  %v2414_v16 = vcombine.high %v3675_v58, %v3678_v59  ;;  %v606_v37 = vadd.bf16 %v478_v50, %v350_v14  ;;  %v354_v0 = vld [vmem:[%s4337_s0 + $0x380] sm:$0xff]  ;;  %v293_v50 = vld [vmem:[%s4337_s0 + $0x198] sm:$0xff] }
  0x52   : > { %2119 = vmatprep.subr.bf16.mxu0 %v2556_v15  ;;  %v2559_v15 = vcombine.low %v3641_v48, %v3644_v51  ;;  %v2497_v42 = vcombine.low %v3663_v60, %v3666_v61  ;;  %v544_v43 = vadd.bf16 %v416_v27, %v288_v22  ;;  %v3788_v48 = vld [vmem:[%s3308_s5 + $0xf0] sm:$0xff]  ;;  %v608_v51 = vadd.bf16 %v480_v34, %v352_v29  ;;  %v485_v29 = vld [vmem:[%s4338_s1 + $0x398] sm:$0xff] }
  0x53   : > { %1894 = vmatpush1.bf16.msra.mxu1 %v2491_v31  ;;  %v542_v31 = vadd.bf16 %v414_v9, %v3690_v4  ;;  %v2500_v53 = vcombine.high %v3746_v25, %v3749_v26  ;;  %v2564_v60 = vcombine.high %v3761_v30, %v3774_v36  ;;  %v2499_v61 = vcombine.low %v3746_v25, %v3749_v26  ;;  %v356_v22 = vld [vmem:[%s4337_s0 + $0x390] sm:$0xff]  ;;  %v294_v30 = vld [vmem:[%s4337_s0 + $0x1a0] sm:$0xff] }
  0x54   : > { %1895 = vmatprep.subr.bf16.mxu1 %v2494_v41  ;;  %v2413_v41 = vcombine.low %v3675_v58, %v3678_v59  ;;  %v3809_v62 = vmax.bf16 %v2734_v11, %v606_v37  ;;  %v291_v58 = vld [vmem:[%s4337_s0 + $0x188] sm:$0xff]  ;;  %v3828_v3 = vmax.bf16 %v2734_v11, %v544_v43  ;;  %v3831_v4 = vmax.bf16 %v2734_v11, %v545_v44  ;;  %v422_v36 = vld [vmem:[%s4338_s1 + $0x1a0] sm:$0xff] }
  0x55   : > { %2120 = vmatpush1.bf16.msra.mxu0 %v2555_v35  ;;  %v481_v35 = vld [vmem:[%s4338_s1 + $0x378] sm:$0xff]  ;;  %v3793_v54 = vmax.bf16 %v2734_v11, %v542_v31  ;;  %v419_v59 = vld [vmem:[%s4338_s1 + $0x188] sm:$0xff] }
  0x56   : > { %2121 = vmatprep.subr.bf16.mxu0 %v2558_v47  ;;  %1821 = vmatmul.mubr.bf16.gmra.mrb[4].mxu1 %v2401_v32  ;;  %v543_v32 = vadd.bf16 %v415_v38, %v287_v8  ;;  %v3785_v47 = vld [vmem:[%s3308_s5 + $0xd0] sm:$0xff]  ;;  %v609_v52 = vadd.bf16 %v481_v35, %v353_v33  ;;  %v3843_v8 = vmax.bf16 %v2734_v11, %v608_v51  ;;  %v3849_v38 = vld [vmem:[%s3308_s5 + $0x100] sm:$0xff]  ;;  %v295_v31 = vld [vmem:[%s4337_s0 + $0x1a8] sm:$0xff] }
  0x57   : > { %1896 = vmatpush1.bf16.msra.mxu1 %v2493_v56  ;;  %1830 = vmatprep.mubr.bf16.mxu1 %v2410_v12  ;;  %v290_v56 = vld [vmem:[%s4337_s0 + $0x180] sm:$0xff]  ;;  %v2422_v1 = vcombine.high %v3785_v47, %v3788_v48  ;;  %v3857_v12 = vld [vmem:[%s4337_s0 + $0x190] sm:$0xff]  ;;  %v547_v49 = vadd.bf16 %v419_v59, %v291_v58  ;;  %v2421_v25 = vcombine.low %v3785_v47, %v3788_v48  ;;  %v423_v37 = vld [vmem:[%s4338_s1 + $0x1a8] sm:$0xff] }
  0x58   : > { %2047 = vmatmul.mubr.bf16.gmra.mrb[4].mxu0 %v2405_v55  ;;  %1897 = vmatprep.subr.bf16.mxu1 %v2496_v6  ;;  %v3796_v55 = vmax.bf16 %v2734_v11, %v543_v32  ;;  %v482_v6 = vld [vmem:[%s4338_s1 + $0x380] sm:$0xff]  ;;  %v3846_v9 = vmax.bf16 %v2734_v11, %v609_v52  ;;  %v2565_v27 = vcombine.low %v3809_v62, %v3812_v63  ;;  %v359_v44 = vld [vmem:[%s4337_s0 + $0x3a8] sm:$0xff] }
  0x59   : > { %2122 = vmatpush1.bf16.msra.mxu0 %v2557_v5  ;;  %2056 = vmatprep.mubr.bf16.mxu0 %v2414_v16  ;;  %v355_v5 = vld [vmem:[%s4337_s0 + $0x388] sm:$0xff]  ;;  %v421_v16 = vld [vmem:[%s4338_s1 + $0x198] sm:$0xff]  ;;  %v610_v20 = vadd.bf16 %v482_v6, %v354_v0  ;;  %v2504_v32 = vcombine.high %v3828_v3, %v3831_v4  ;;  %v2503_v34 = vcombine.low %v3828_v3, %v3831_v4  ;;  %v3978_v6 = vld [vmem:[%s3308_s5 + $0x140] sm:$0xff] }
  0x5a   : > { %2123 = vmatprep.subr.bf16.mxu0 %v2560_v39  ;;  %v3852_v39 = vld [vmem:[%s3308_s5 + $0x120] sm:$0xff]  ;;  %v2502_v14 = vcombine.high %v3793_v54, %v3796_v55  ;;  %v611_v21 = vadd.bf16 %v483_v7, %v355_v5  ;;  %v2501_v26 = vcombine.low %v3793_v54, %v3796_v55  ;;  %v2568_v33 = vcombine.high %v3843_v8, %v3846_v9  ;;  %v297_v0 = vld [vmem:[%s4337_s0 + $0x1b8] sm:$0xff]  ;;  %v360_v7 = vld [vmem:[%s4337_s0 + $0x3b0] sm:$0xff] }
  0x5b   : > { %1898 = vmatpush1.bf16.msra.mxu1 %v2495_v10  ;;  %v546_v10 = vadd.bf16 %v418_v57, %v290_v56  ;;  %v2426_v28 = vcombine.high %v3849_v38, %v3852_v39  ;;  %v549_v43 = vadd.bf16 %v421_v16, %v293_v50  ;;  %v3938_v47 = vmax.bf16 %v2734_v11, %v610_v20  ;;  %v4009_v50 = vld [vmem:[%s3308_s5 + $0x170] sm:$0xff] }
  0x5c   : > { %1899 = vmatprep.subr.bf16.mxu1 %v2498_v18  ;;  %v3875_v18 = vld [vmem:[%s3308_s5 + $0x110] sm:$0xff]  ;;  %v3941_v48 = vmax.bf16 %v2734_v11, %v611_v21  ;;  %v613_v52 = vadd.bf16 %v485_v29, %v357_v23  ;;  %v2425_v54 = vcombine.low %v3849_v38, %v3852_v39  ;;  %v550_v55 = vadd.bf16 %v422_v36, %v294_v30  ;;  %v3991_v39 = vld [vmem:[%s3308_s5 + $0x160] sm:$0xff]  ;;  %v299_v23 = vld [vmem:[%s4337_s0 + $0x1c8] sm:$0xff] }
  0x5d   : > { %2124 = vmatpush1.bf16.msra.mxu0 %v2559_v15  ;;  %v420_v15 = vld [vmem:[%s4338_s1 + $0x190] sm:$0xff]  ;;  %v3913_v35 = vmax.bf16 %v2734_v11, %v546_v10  ;;  %v551_v56 = vadd.bf16 %v423_v37, %v295_v31  ;;  %v2567_v57 = vcombine.low %v3843_v8, %v3846_v9  ;;  %v3958_v59 = vmax.bf16 %v2734_v11, %v549_v43  ;;  %v362_v29 = vld [vmem:[%s4337_s0 + $0x3c0] sm:$0xff]  ;;  %v363_v30 = vld [vmem:[%s4337_s0 + $0x3c8] sm:$0xff] }
  0x5e   : > { %2125 = vmatprep.subr.bf16.mxu0 %v2562_v24  ;;  %1831 = vmatmul.mubr.bf16.gmra.mrb[8].mxu1 %v2409_v17  ;;  %v2566_v17 = vcombine.high %v3809_v62, %v3812_v63  ;;  %v484_v24 = vld [vmem:[%s4338_s1 + $0x390] sm:$0xff]  ;;  %v2570_v3 = vcombine.high %v3938_v47, %v3941_v48  ;;  %v3975_v5 = vmax.bf16 %v2734_v11, %v613_v52  ;;  %v490_v31 = vld [vmem:[%s4338_s1 + $0x3c0] sm:$0xff]  ;;  %v491_v36 = vld [vmem:[%s4338_s1 + $0x3c8] sm:$0xff] }
  0x5f   : > { %1900 = vmatpush1.bf16.msra.mxu1 %v2497_v42  ;;  %1840 = vmatprep.mubr.bf16.mxu1 %v2418_v46  ;;  %v548_v42 = vadd.bf16 %v420_v15, %v3857_v12  ;;  %v487_v46 = vld [vmem:[%s4338_s1 + $0x3a8] sm:$0xff]  ;;  %v612_v51 = vadd.bf16 %v484_v24, %v356_v22  ;;  %v296_v62 = vld [vmem:[%s4337_s0 + $0x1b0] sm:$0xff]  ;;  %v2429_v9 = vcombine.low %v3875_v18, %v3878_v19  ;;  %v426_v24 = vld [vmem:[%s4338_s1 + $0x1c0] sm:$0xff] }
  0x60   : > { %2057 = vmatmul.mubr.bf16.gmra.mrb[8].mxu0 %v2413_v41  ;;  %1901 = vmatprep.subr.bf16.mxu1 %v2500_v53  ;;  %v3925_v41 = vmax.bf16 %v2734_v11, %v547_v49  ;;  %v2430_v53 = vcombine.high %v3875_v18, %v3878_v19  ;;  %v488_v8 = vld [vmem:[%s4338_s1 + $0x3b0] sm:$0xff]  ;;  %v3994_v10 = vmax.bf16 %v2734_v11, %v550_v55  ;;  %v4020_v19 = vld [vmem:[%s4337_s0 + $0x1c0] sm:$0xff]  ;;  %v365_v52 = vld [vmem:[%s4337_s0 + $0x3d8] sm:$0xff] }
  0x61   : > { %2126 = vmatpush1.bf16.msra.mxu0 %v2561_v45  ;;  %2066 = vmatprep.mubr.bf16.mxu0 %v2422_v1  ;;  %v486_v45 = vld [vmem:[%s4338_s1 + $0x3a0] sm:$0xff]  ;;  %v3955_v58 = vmax.bf16 %v2734_v11, %v548_v42  ;;  %v424_v1 = vld [vmem:[%s4338_s1 + $0x1b0] sm:$0xff]  ;;  %v3972_v4 = vmax.bf16 %v2734_v11, %v612_v51  ;;  %v3997_v12 = vmax.bf16 %v2734_v11, %v551_v56 }
  0x62   : > { %2127 = vmatprep.subr.bf16.mxu0 %v2564_v60  ;;  %v614_v60 = vadd.bf16 %v486_v45, %v358_v40  ;;  %v2506_v63 = vcombine.high %v3913_v35, %v3925_v41  ;;  %v2505_v38 = vcombine.low %v3913_v35, %v3925_v41  ;;  %v4006_v49 = vld [vmem:[%s3308_s5 + $0x150] sm:$0xff]  ;;  %v2569_v20 = vcombine.low %v3938_v47, %v3941_v48  ;;  %v301_v40 = vld [vmem:[%s4337_s0 + $0x1d8] sm:$0xff] }
  0x63   : > { %1902 = vmatpush1.bf16.msra.mxu1 %v2499_v61  ;;  %v615_v61 = vadd.bf16 %v487_v46, %v359_v44  ;;  %v2508_v21 = vcombine.high %v3955_v58, %v3958_v59  ;;  %v616_v22 = vadd.bf16 %v488_v8, %v360_v7  ;;  %v2510_v35 = vcombine.high %v3994_v10, %v3997_v12  ;;  %v300_v37 = vld [vmem:[%s4337_s0 + $0x1d0] sm:$0xff]  ;;  %v429_v45 = vld [vmem:[%s4338_s1 + $0x1d8] sm:$0xff] }
  0x64   : > { %1903 = vmatprep.subr.bf16.mxu1 %v2502_v14  ;;  %v489_v14 = vld [vmem:[%s4338_s1 + $0x3b8] sm:$0xff]  ;;  %v4012_v15 = vmax.bf16 %v2734_v11, %v614_v60  ;;  %v428_v44 = vld [vmem:[%s4338_s1 + $0x1d0] sm:$0xff]  ;;  %v554_v48 = vadd.bf16 %v426_v24, %v4020_v19  ;;  %v618_v56 = vadd.bf16 %v490_v31, %v362_v29  ;;  %v2433_v60 = vcombine.low %v3978_v6, %v3991_v39  ;;  %v367_v19 = vld [vmem:[%s4337_s0 + $0x3e8] sm:$0xff] }
  0x65   : > { %2128 = vmatpush1.bf16.msra.mxu0 %v2563_v13  ;;  %v361_v13 = vld [vmem:[%s4337_s0 + $0x3b8] sm:$0xff]  ;;  %v4015_v16 = vmax.bf16 %v2734_v11, %v615_v61  ;;  %v364_v46 = vld [vmem:[%s4337_s0 + $0x3d0] sm:$0xff]  ;;  %v4083_v47 = vmax.bf16 %v2734_v11, %v616_v22  ;;  %v2437_v61 = vcombine.low %v4006_v49, %v4009_v50  ;;  %v4177_v24 = vld [vmem:[%s3308_s5 + $0x1c0] sm:$0xff] }
  0x66   : > { %2129 = vmatprep.subr.bf16.mxu0 %v2566_v17  ;;  %1841 = vmatmul.mubr.bf16.gmra.mrb[12].mxu1 %v2417_v2  ;;  %v425_v2 = vld [vmem:[%s4338_s1 + $0x1b8] sm:$0xff]  ;;  %v552_v17 = vadd.bf16 %v424_v1, %v296_v62  ;;  %v4103_v62 = vld [vmem:[%s3308_s5 + $0x180] sm:$0xff]  ;;  %v4121_v7 = vmax.bf16 %v2734_v11, %v554_v48 }
  0x67   : > { %1904 = vmatpush1.bf16.msra.mxu1 %v2501_v26  ;;  %1850 = vmatprep.mubr.bf16.mxu1 %v2426_v28  ;;  %v553_v18 = vadd.bf16 %v425_v2, %v297_v0  ;;  %v2572_v26 = vcombine.high %v3972_v4, %v3975_v5  ;;  %v617_v28 = vadd.bf16 %v489_v14, %v361_v13  ;;  %v4113_v2 = vld [vmem:[%s3308_s5 + $0x190] sm:$0xff]  ;;  %v303_v14 = vld [vmem:[%s4337_s0 + $0x1e8] sm:$0xff]  ;;  %v305_v31 = vld [vmem:[%s4337_s0 + $0x1f8] sm:$0xff] }
  0x68   : > { %2067 = vmatmul.mubr.bf16.gmra.mrb[12].mxu0 %v2421_v25  ;;  %1905 = vmatprep.subr.bf16.mxu1 %v2504_v32  ;;  %v427_v25 = vld [vmem:[%s4338_s1 + $0x1c8] sm:$0xff]  ;;  %v2507_v32 = vcombine.low %v3955_v58, %v3958_v59  ;;  %v2574_v41 = vcombine.high %v4012_v15, %v4015_v16  ;;  %v4068_v42 = vmax.bf16 %v2734_v11, %v552_v17 }
  0x69   : > { %2130 = vmatpush1.bf16.msra.mxu0 %v2565_v27  ;;  %2076 = vmatprep.mubr.bf16.mxu0 %v2430_v53  ;;  %v2434_v27 = vcombine.high %v3978_v6, %v3991_v39  ;;  %v4071_v43 = vmax.bf16 %v2734_v11, %v553_v18  ;;  %v555_v51 = vadd.bf16 %v427_v25, %v299_v23  ;;  %v492_v53 = vld [vmem:[%s4338_s1 + $0x3d0] sm:$0xff] }
  0x6a   : > { %2131 = vmatprep.subr.bf16.mxu0 %v2568_v33  ;;  %v2571_v33 = vcombine.low %v3972_v4, %v3975_v5  ;;  %v4096_v55 = vmax.bf16 %v2734_v11, %v617_v28  ;;  %v556_v58 = vadd.bf16 %v428_v44, %v300_v37  ;;  %v557_v59 = vadd.bf16 %v429_v45, %v301_v40  ;;  %v4184_v28 = vld [vmem:[%s3308_s5 + $0x1e0] sm:$0xff]  ;;  %v368_v37 = vld [vmem:[%s4337_s0 + $0x3f0] sm:$0xff]  ;;  %v369_v44 = vld [vmem:[%s4337_s0 + $0x3f8] sm:$0xff] }
  0x6b   : > { %1906 = vmatpush1.bf16.msra.mxu1 %v2503_v34  ;;  %v2438_v34 = vcombine.high %v4006_v49, %v4009_v50  ;;  %v2509_v0 = vcombine.low %v3994_v10, %v3997_v12  ;;  %v2573_v1 = vcombine.low %v4012_v15, %v4015_v16  ;;  %v620_v4 = vadd.bf16 %v492_v53, %v364_v46  ;;  %v431_v49 = vld [vmem:[%s4338_s1 + $0x1e8] sm:$0xff]  ;;  %v366_v50 = vld [vmem:[%s4337_s0 + $0x3e0] sm:$0xff]  ;;  %v496_v45 = vld [vmem:[%s4338_s1 + $0x3f0] sm:$0xff] }
  0x6c   : > { %1907 = vmatprep.subr.bf16.mxu1 %v2506_v63  ;;  %v4106_v63 = vld [vmem:[%s3308_s5 + $0x1a0] sm:$0xff]  ;;  %v2512_v6 = vcombine.high %v4068_v42, %v4071_v43  ;;  %v4124_v8 = vmax.bf16 %v2734_v11, %v555_v51  ;;  %v2576_v39 = vcombine.high %v4083_v47, %v4096_v55  ;;  %v4137_v12 = vmax.bf16 %v2734_v11, %v618_v56  ;;  %v497_v46 = vld [vmem:[%s4338_s1 + $0x3f8] sm:$0xff]  ;;  %v816_v53 = vld [vmem:[%s3308_s5 + $0x1f0] sm:$0xff] }
  0x6d   : > { %2132 = vmatpush1.bf16.msra.mxu0 %v2567_v57  ;;  %v619_v57 = vadd.bf16 %v491_v36, %v363_v30  ;;  %v2442_v10 = vcombine.high %v4103_v62, %v4106_v63  ;;  %v2511_v15 = vcombine.low %v4068_v42, %v4071_v43  ;;  %v4156_v17 = vmax.bf16 %v2734_v11, %v556_v58  ;;  %v304_v30 = vld [vmem:[%s4337_s0 + $0x1f0] sm:$0xff]  ;;  %v433_v36 = vld [vmem:[%s4338_s1 + $0x1f8] sm:$0xff] }
  0x6e   : > { %2133 = vmatprep.subr.bf16.mxu0 %v2570_v3  ;;  %1851 = vmatmul.mubr.bf16.gmra.mrb[16].mxu1 %v2425_v54  ;;  %v493_v54 = vld [vmem:[%s4338_s1 + $0x3d8] sm:$0xff]  ;;  %v4116_v3 = vld [vmem:[%s3308_s5 + $0x1b0] sm:$0xff]  ;;  %v4159_v18 = vmax.bf16 %v2734_v11, %v557_v59  ;;  %v4171_v22 = vmax.bf16 %v2734_v11, %v620_v4  ;;  %v559_v29 = vadd.bf16 %v431_v49, %v303_v14 }
  0x6f   : > { %1908 = vmatpush1.bf16.msra.mxu1 %v2505_v38  ;;  %1860 = vmatprep.mubr.bf16.mxu1 %v2434_v27  ;;  %v621_v5 = vadd.bf16 %v493_v54, %v365_v52  ;;  %v430_v38 = vld [vmem:[%s4338_s1 + $0x1e0] sm:$0xff]  ;;  %v4140_v13 = vmax.bf16 %v2734_v11, %v619_v57  ;;  %v2446_v16 = vcombine.high %v4113_v2, %v4116_v3  ;;  %v812_v52 = vld [vmem:[%s3308_s5 + $0x1d0] sm:$0xff] }
  0x70   : > { %2077 = vmatmul.mubr.bf16.gmra.mrb[16].mxu0 %v2429_v9  ;;  %1909 = vmatprep.subr.bf16.mxu1 %v2508_v21  ;;  %v302_v9 = vld [vmem:[%s4337_s0 + $0x1e0] sm:$0xff]  ;;  %v495_v21 = vld [vmem:[%s4338_s1 + $0x3e8] sm:$0xff]  ;;  %v2514_v27 = vcombine.high %v4121_v7, %v4124_v8  ;;  %v2441_v40 = vcombine.low %v4103_v62, %v4106_v63  ;;  %v2513_v42 = vcombine.low %v4121_v7, %v4124_v8 }
  0x71   : > { %2134 = vmatpush1.bf16.msra.mxu0 %v2569_v20  ;;  %2086 = vmatprep.mubr.bf16.mxu0 %v2438_v34  ;;  %v494_v20 = vld [vmem:[%s4338_s1 + $0x3e0] sm:$0xff]  ;;  %v4174_v23 = vmax.bf16 %v2734_v11, %v621_v5  ;;  %v558_v25 = vadd.bf16 %v430_v38, %v302_v9  ;;  %v623_v34 = vadd.bf16 %v495_v21, %v367_v19  ;;  %v755_v8 = vld [vmem:[%s3308_s5 + $0x8] sm:$0xff]  ;;  %v765_v19 = vld [vmem:[%s3308_s5 + $0x58] sm:$0xff] }
  0x72   : > { %2135 = vmatprep.subr.bf16.mxu0 %v2572_v26  ;;  %v2575_v26 = vcombine.low %v4083_v47, %v4096_v55  ;;  %v2577_v43 = vcombine.low %v4137_v12, %v4140_v13  ;;  %v2516_v47 = vcombine.high %v4156_v17, %v4159_v18  ;;  %v2450_v51 = vcombine.high %v4177_v24, %v4184_v28  ;;  %v759_v9 = vld [vmem:[%s3308_s5 + $0x28] sm:$0xff] }
  0x73   : > { %1910 = vmatpush1.bf16.msra.mxu1 %v2507_v32  ;;  %v2578_v32 = vcombine.high %v4137_v12, %v4140_v13  ;;  %v2580_v48 = vcombine.high %v4171_v22, %v4174_v23  ;;  %v686_v54 = vmax.bf16 %v2734_v11, %v558_v25  ;;  %v687_v55 = vmax.bf16 %v2734_v11, %v559_v29  ;;  %v761_v12 = vld [vmem:[%s3308_s5 + $0x38] sm:$0xff]  ;;  %v771_v25 = vld [vmem:[%s3308_s5 + $0x88] sm:$0xff] }
  0x74   : > { %1911 = vmatprep.subr.bf16.mxu1 %v2510_v35  ;;  %v432_v35 = vld [vmem:[%s4338_s1 + $0x1f0] sm:$0xff]  ;;  %v561_v57 = vadd.bf16 %v433_v36, %v305_v31  ;;  %v624_v62 = vadd.bf16 %v496_v45, %v368_v37  ;;  %v625_v63 = vadd.bf16 %v497_v46, %v369_v44  ;;  %v2454_v58 = vcombine.high %v812_v52, %v816_v53  ;;  %v785_v36 = vld [vmem:[%s3308_s5 + $0xf8] sm:$0xff]  ;;  %v791_v44 = vld [vmem:[%s3308_s5 + $0x128] sm:$0xff] }
  0x75   : > { %2136 = vmatpush1.bf16.msra.mxu0 %v2571_v33  ;;  %v622_v33 = vadd.bf16 %v494_v20, %v366_v50  ;;  %v560_v56 = vadd.bf16 %v432_v35, %v304_v30  ;;  %v2515_v59 = vcombine.low %v4156_v17, %v4159_v18  ;;  %v2449_v7 = vcombine.low %v4177_v24, %v4184_v28  ;;  %v763_v17 = vld [vmem:[%s3308_s5 + $0x48] sm:$0xff]  ;;  %v769_v20 = vld [vmem:[%s3308_s5 + $0x78] sm:$0xff] }
  0x76   : > { %2137 = vmatprep.subr.bf16.mxu0 %v2574_v41  ;;  %1861 = vmatmul.mubr.bf16.gmra.mrb[20].mxu1 %v2433_v60  ;;  %v2445_v41 = vcombine.low %v4113_v2, %v4116_v3  ;;  %v689_v3 = vmax.bf16 %v2734_v11, %v561_v57  ;;  %v752_v5 = vmax.bf16 %v2734_v11, %v624_v62  ;;  %v767_v18 = vld [vmem:[%s3308_s5 + $0x68] sm:$0xff]  ;;  %v777_v28 = vld [vmem:[%s3308_s5 + $0xb8] sm:$0xff] }
  0x77   : > { %1912 = vmatpush1.bf16.msra.mxu1 %v2509_v0  ;;  %1870 = vmatprep.mubr.bf16.mxu1 %v2442_v10  ;;  %v750_v60 = vmax.bf16 %v2734_v11, %v622_v33  ;;  %v2579_v0 = vcombine.low %v4171_v22, %v4174_v23  ;;  %v688_v2 = vmax.bf16 %v2734_v11, %v560_v56  ;;  %v757_v10 = vld [vmem:[%s3308_s5 + $0x18] sm:$0xff]  ;;  %v779_v33 = vld [vmem:[%s3308_s5 + $0xc8] sm:$0xff] }
  0x78   : > { %2087 = vmatmul.mubr.bf16.gmra.mrb[20].mxu0 %v2437_v61  ;;  %1913 = vmatprep.subr.bf16.mxu1 %v2512_v6  ;;  %v751_v61 = vmax.bf16 %v2734_v11, %v623_v34  ;;  %v753_v6 = vmax.bf16 %v2734_v11, %v625_v63  ;;  %v2453_v38 = vcombine.low %v812_v52, %v816_v53  ;;  %v783_v34 = vld [vmem:[%s3308_s5 + $0xe8] sm:$0xff]  ;;  %v781_v35 = vld [vmem:[%s3308_s5 + $0xd8] sm:$0xff] }
  0x79   : > { %2138 = vmatpush1.bf16.msra.mxu0 %v2573_v1  ;;  %2096 = vmatprep.mubr.bf16.mxu0 %v2446_v16  ;;  %v2518_v1 = vcombine.high %v686_v54, %v687_v55  ;;  %v2520_v14 = vcombine.high %v688_v2, %v689_v3  ;;  %v2396_v49 = vcombine.high %v755_v8, %v759_v9  ;;  %v789_v45 = vld [vmem:[%s3308_s5 + $0x118] sm:$0xff]  ;;  %v795_v53 = vld [vmem:[%s3308_s5 + $0x148] sm:$0xff] }
  0x7a   : > { %2139 = vmatprep.subr.bf16.mxu0 %v2576_v39  ;;  %v2582_v4 = vcombine.high %v750_v60, %v751_v61  ;;  %v2517_v39 = vcombine.low %v686_v54, %v687_v55  ;;  %v2581_v13 = vcombine.low %v750_v60, %v751_v61  ;;  %v2584_v11 = vcombine.high %v752_v5, %v753_v6  ;;  %v793_v46 = vld [vmem:[%s3308_s5 + $0x138] sm:$0xff]  ;;  %v799_v54 = vld [vmem:[%s3308_s5 + $0x168] sm:$0xff] }
  0x7b   : > { %1914 = vmatpush1.bf16.msra.mxu1 %v2511_v15  ;;  %v2400_v50 = vcombine.high %v757_v10, %v761_v12  ;;  %v2519_v15 = vcombine.low %v688_v2, %v689_v3  ;;  %v2583_v16 = vcombine.low %v752_v5, %v753_v6  ;;  %v2395_v21 = vcombine.low %v755_v8, %v759_v9  ;;  %v797_v55 = vld [vmem:[%s3308_s5 + $0x158] sm:$0xff]  ;;  %v803_v63 = vld [vmem:[%s3308_s5 + $0x188] sm:$0xff] }
  0x7c   : > { %1915 = vmatprep.subr.bf16.mxu1 %v2514_v27  ;;  %v2399_v22 = vcombine.low %v757_v10, %v761_v12  ;;  %v2404_v23 = vcombine.high %v763_v17, %v767_v18  ;;  %v2408_v24 = vcombine.high %v765_v19, %v769_v20  ;;  %v773_v27 = vld [vmem:[%s3308_s5 + $0x98] sm:$0xff]  ;;  %v2403_v29 = vcombine.low %v763_v17, %v767_v18  ;;  %v811_v5 = vld [vmem:[%s3308_s5 + $0x1c8] sm:$0xff] }
  0x7d   : > { %2140 = vmatpush1.bf16.msra.mxu0 %v2575_v26  ;;  %v775_v26 = vld [vmem:[%s3308_s5 + $0xa8] sm:$0xff]  ;;  %v2407_v30 = vcombine.low %v765_v19, %v769_v20  ;;  %v2432_v52 = vcombine.high %v789_v45, %v793_v46  ;;  %v801_v56 = vld [vmem:[%s3308_s5 + $0x178] sm:$0xff]  ;;  %v2431_v60 = vcombine.low %v789_v45, %v793_v46  ;;  %v2436_v61 = vcombine.high %v795_v53, %v799_v54 }
  0x7e   : > { %2141 = vmatprep.subr.bf16.mxu0 %v2578_v32  ;;  %1871 = vmatmul.mubr.bf16.gmra.mrb[24].mxu1 %v2441_v40  ;;  %v2412_v31 = vcombine.high %v771_v25, %v775_v26  ;;  %v2416_v32 = vcombine.high %v773_v27, %v777_v28  ;;  %v2411_v37 = vcombine.low %v771_v25, %v775_v26  ;;  %v815_v6 = vld [vmem:[%s3308_s5 + $0x1e8] sm:$0xff]  ;;  %v817_v8 = vld [vmem:[%s3308_s5 + $0x1f8] sm:$0xff] }
  0x7f   : > { %1916 = vmatpush1.bf16.msra.mxu1 %v2513_v42  ;;  %1880 = vmatprep.mubr.bf16.mxu1 %v2450_v51  ;;  %v2415_v40 = vcombine.low %v773_v27, %v777_v28  ;;  %v2424_v42 = vcombine.high %v781_v35, %v785_v36  ;;  %v2440_v62 = vcombine.high %v797_v55, %v801_v56 }
  0x80   : > { %2097 = vmatmul.mubr.bf16.gmra.mrb[24].mxu0 %v2445_v41  ;;  %1917 = vmatprep.subr.bf16.mxu1 %v2516_v47  ;;  %v2420_v41 = vcombine.high %v779_v33, %v783_v34  ;;  %v2419_v47 = vcombine.low %v779_v33, %v783_v34  ;;  %v2439_v2 = vcombine.low %v797_v55, %v801_v56 }
  0x81   : > { %2142 = vmatpush1.bf16.msra.mxu0 %v2577_v43  ;;  %2106 = vmatprep.mubr.bf16.mxu0 %v2454_v58  ;;  %v787_v43 = vld [vmem:[%s3308_s5 + $0x108] sm:$0xff]  ;;  %v2451_v12 = vcombine.low %v811_v5, %v815_v6 }
  0x82   : > { %2143 = vmatprep.subr.bf16.mxu0 %v2580_v48  ;;  %v2423_v48 = vcombine.low %v781_v35, %v785_v36  ;;  %v2428_v51 = vcombine.high %v787_v43, %v791_v44  ;;  %v2427_v57 = vcombine.low %v787_v43, %v791_v44  ;;  %v807_v58 = vld [vmem:[%s3308_s5 + $0x1a8] sm:$0xff] }
  0x83   : > { %1918 = vmatpush1.bf16.msra.mxu1 %v2515_v59  ;;  %v805_v59 = vld [vmem:[%s3308_s5 + $0x198] sm:$0xff]  ;;  %v2444_v3 = vcombine.high %v803_v63, %v807_v58  ;;  %v2443_v9 = vcombine.low %v803_v63, %v807_v58 }
  0x84   : > { %1919 = vmatprep.subr.bf16.mxu1 %v2518_v1  ;;  %v2435_v1 = vcombine.low %v795_v53, %v799_v54 }
  0x85   : > { %2144 = vmatpush1.bf16.msra.mxu0 %v2579_v0  ;;  %v809_v0 = vld [vmem:[%s3308_s5 + $0x1b8] sm:$0xff] }
  0x86   : > { %2145 = vmatprep.subr.bf16.mxu0 %v2582_v4  ;;  %1881 = vmatmul.mubr.bf16.gmra.mrb[28].mxu1 %v2449_v7  ;;  %v2448_v4 = vcombine.high %v805_v59, %v809_v0  ;;  %v813_v7 = vld [vmem:[%s3308_s5 + $0x1d8] sm:$0xff] }
  0x87   : > { %1920 = vmatpush1.bf16.msra.mxu1 %v2517_v39  ;;  %1923 = vmatprep.mubr.bf16.mxu1 %v2396_v49  ;;  %v2452_v39 = vcombine.high %v811_v5, %v815_v6  ;;  %v2456_v10 = vcombine.high %v813_v7, %v817_v8 }
  0x88   : > { %2107 = vmatmul.mubr.bf16.gmra.mrb[28].mxu0 %v2453_v38  ;;  %1921 = vmatprep.subr.bf16.mxu1 %v2520_v14  ;;  %v2447_v38 = vcombine.low %v805_v59, %v809_v0 }
  0x89   : > { %2146 = vmatpush1.bf16.msra.mxu0 %v2581_v13  ;;  %2149 = vmatprep.mubr.bf16.mxu0 %v2400_v50  ;;  %v2455_v13 = vcombine.low %v813_v7, %v817_v8 }
  0x8a   : > { %2147 = vmatprep.subr.bf16.mxu0 %v2584_v11 }
  0x8b   : > { %1922 = vmatpush1.bf16.msra.mxu1 %v2519_v15 }
  0x8d   : > { %2148 = vmatpush1.bf16.msra.mxu0 %v2583_v16 }
  0x8e   : > { %1924 = vmatmul.mubr.bf16.vlgmr.msra.gmra.mrb[0].mxu1 %v2395_v21 }
  0x8f   : > { %1933 = vmatprep.mubr.bf16.mxu1 %v2404_v23 }
  0x90   : > { %2150 = vmatmul.mubr.bf16.vlgmr.msra.gmra.mrb[0].mxu0 %v2399_v22 }
  0x91   : > { %2159 = vmatprep.mubr.bf16.mxu0 %v2408_v24 }
  0x96   : > { %1934 = vmatmul.mubr.bf16.gmra.mrb[4].mxu1 %v2403_v29 }
  0x97   : > { %1943 = vmatprep.mubr.bf16.mxu1 %v2412_v31 }
  0x98   : > { %2160 = vmatmul.mubr.bf16.gmra.mrb[4].mxu0 %v2407_v30 }
  0x99   : > { %2169 = vmatprep.mubr.bf16.mxu0 %v2416_v32 }
  0x9e   : > { %1944 = vmatmul.mubr.bf16.gmra.mrb[8].mxu1 %v2411_v37 }
  0x9f   : > { %1953 = vmatprep.mubr.bf16.mxu1 %v2420_v41 }
  0xa0   : > { %2170 = vmatmul.mubr.bf16.gmra.mrb[8].mxu0 %v2415_v40 }
  0xa1   : > { %2179 = vmatprep.mubr.bf16.mxu0 %v2424_v42 }
  0xa6   : > { %1954 = vmatmul.mubr.bf16.gmra.mrb[12].mxu1 %v2419_v47 }
  0xa7   : > { %1963 = vmatprep.mubr.bf16.mxu1 %v2428_v51 }
  0xa8   : > { %2180 = vmatmul.mubr.bf16.gmra.mrb[12].mxu0 %v2423_v48 }
  0xa9   : > { %2189 = vmatprep.mubr.bf16.mxu0 %v2432_v52 }
  0xae   : > { %1964 = vmatmul.mubr.bf16.gmra.mrb[16].mxu1 %v2427_v57 }
  0xaf   : > { %1973 = vmatprep.mubr.bf16.mxu1 %v2436_v61 }
  0xb0   : > { %2190 = vmatmul.mubr.bf16.gmra.mrb[16].mxu0 %v2431_v60 }
  0xb1   : > { %2199 = vmatprep.mubr.bf16.mxu0 %v2440_v62 }
  0xb6   : > { %1974 = vmatmul.mubr.bf16.gmra.mrb[20].mxu1 %v2435_v1 }
  0xb7   : > { %1983 = vmatprep.mubr.bf16.mxu1 %v2444_v3 }
  0xb8   : > { %2200 = vmatmul.mubr.bf16.gmra.mrb[20].mxu0 %v2439_v2 }
  0xb9   : > { %2209 = vmatprep.mubr.bf16.mxu0 %v2448_v4 }
  0xbe   : > { %1984 = vmatmul.mubr.bf16.gmra.mrb[24].mxu1 %v2443_v9 }
  0xbf   : > { %1993 = vmatprep.mubr.bf16.mxu1 %v2452_v39 }
  0xc0   : > { %2210 = vmatmul.mubr.bf16.gmra.mrb[24].mxu0 %v2447_v38 }
  0xc1   : > { %2219 = vmatprep.mubr.bf16.mxu0 %v2456_v10 }
  0xc6   : > { %1994 = vmatmul.mubr.bf16.gmra.mrb[28].mxu1 %v2451_v12 }
  0xc8   : > { %2220 = vmatmul.mubr.bf16.gmra.mrb[28].mxu0 %v2455_v13 }
 0x161   : > { %v1925_v14 = vpop.f32.mrb[0].mxu1 }
 0x162   : > { %v1927_v49 = vpop.f32.mrb[1].mxu1 }
 0x163   : > { %v2151_v11 = vpop.f32.mrb[0].mxu0  ;;  %v1929_v16 = vpop.f32.mrb[2].mxu1 }
 0x164   : > { %v2589_v50 = vadd.f32 %v2151_v11, %v1925_v14  ;;  %v2153_v15 = vpop.f32.mrb[1].mxu0  ;;  %v1931_v19 = vpop.f32.mrb[3].mxu1 }
 0x165   : > { %v2590_v17 = vadd.f32 %v2153_v15, %v1927_v49  ;;  %v2155_v18 = vpop.f32.mrb[2].mxu0 }
 0x166   : > { %2230 = vst [vmem:[%s4278_s22] sm:$0xff] %v2589_v50  ;;  %v2591_v20 = vadd.f32 %v2155_v18, %v1929_v16  ;;  %v2157_v21 = vpop.f32.mrb[3].mxu0 }
 0x167   : > { %2232 = vst.msk [vmem:[%s4278_s22 + $0x8] sm:$0xff] %vm2231_vm0, %v2590_v17  ;;  %v2592_v22 = vadd.f32 %v2157_v21, %v1931_v19 }
 0x168   : > { %2233 = vst [vmem:[%s4278_s22 + $0x10] sm:$0xff] %v2591_v20 }
 0x169   : > { %2234 = vst.msk [vmem:[%s4278_s22 + $0x18] sm:$0xff] %vm2231_vm0, %v2592_v22  ;;  %v1935_v23 = vpop.f32.mrb[4].mxu1 }
 0x16a   : > { %v1937_v25 = vpop.f32.mrb[5].mxu1 }
 0x16b   : > { %v2161_v24 = vpop.f32.mrb[4].mxu0  ;;  %v1939_v28 = vpop.f32.mrb[6].mxu1 }
 0x16c   : > { %v2593_v26 = vadd.f32 %v2161_v24, %v1935_v23  ;;  %v2163_v27 = vpop.f32.mrb[5].mxu0  ;;  %v1941_v31 = vpop.f32.mrb[7].mxu1 }
 0x16d   : > { %v2594_v29 = vadd.f32 %v2163_v27, %v1937_v25  ;;  %v2165_v30 = vpop.f32.mrb[6].mxu0 }
 0x16e   : > { %2235 = vst [vmem:[%s4278_s22 + $0x20] sm:$0xff] %v2593_v26  ;;  %v2595_v32 = vadd.f32 %v2165_v30, %v1939_v28  ;;  %v2167_v33 = vpop.f32.mrb[7].mxu0 }
 0x16f   : > { %2236 = vst.msk [vmem:[%s4278_s22 + $0x28] sm:$0xff] %vm2231_vm0, %v2594_v29  ;;  %v2596_v34 = vadd.f32 %v2167_v33, %v1941_v31 }
 0x170   : > { %2237 = vst [vmem:[%s4278_s22 + $0x30] sm:$0xff] %v2595_v32 }
 0x171   : > { %2238 = vst.msk [vmem:[%s4278_s22 + $0x38] sm:$0xff] %vm2231_vm0, %v2596_v34  ;;  %v1945_v35 = vpop.f32.mrb[8].mxu1 }
 0x172   : > { %v1947_v37 = vpop.f32.mrb[9].mxu1 }
 0x173   : > { %v2171_v36 = vpop.f32.mrb[8].mxu0  ;;  %v1949_v42 = vpop.f32.mrb[10].mxu1 }
 0x174   : > { %v2597_v40 = vadd.f32 %v2171_v36, %v1945_v35  ;;  %v2173_v41 = vpop.f32.mrb[9].mxu0  ;;  %v1951_v45 = vpop.f32.mrb[11].mxu1 }
 0x175   : > { %v2598_v43 = vadd.f32 %v2173_v41, %v1947_v37  ;;  %v2175_v44 = vpop.f32.mrb[10].mxu0 }
 0x176   : > { %2239 = vst [vmem:[%s4278_s22 + $0x40] sm:$0xff] %v2597_v40  ;;  %v2599_v46 = vadd.f32 %v2175_v44, %v1949_v42  ;;  %v2177_v47 = vpop.f32.mrb[11].mxu0 }
 0x177   : > { %2240 = vst.msk [vmem:[%s4278_s22 + $0x48] sm:$0xff] %vm2231_vm0, %v2598_v43  ;;  %v2600_v48 = vadd.f32 %v2177_v47, %v1951_v45 }
 0x178   : > { %2241 = vst [vmem:[%s4278_s22 + $0x50] sm:$0xff] %v2599_v46 }
 0x179   : > { %2242 = vst.msk [vmem:[%s4278_s22 + $0x58] sm:$0xff] %vm2231_vm0, %v2600_v48  ;;  %v1955_v51 = vpop.f32.mrb[12].mxu1 }
 0x17a   : > { %v1957_v53 = vpop.f32.mrb[13].mxu1 }
 0x17b   : > { %v2181_v52 = vpop.f32.mrb[12].mxu0  ;;  %v1959_v56 = vpop.f32.mrb[14].mxu1 }
 0x17c   : > { %v2601_v54 = vadd.f32 %v2181_v52, %v1955_v51  ;;  %v2183_v55 = vpop.f32.mrb[13].mxu0  ;;  %v1961_v61 = vpop.f32.mrb[15].mxu1 }
 0x17d   : > { %v2602_v57 = vadd.f32 %v2183_v55, %v1957_v53  ;;  %v2185_v60 = vpop.f32.mrb[14].mxu0 }
 0x17e   : > { %2243 = vst [vmem:[%s4278_s22 + $0x60] sm:$0xff] %v2601_v54  ;;  %v2603_v62 = vadd.f32 %v2185_v60, %v1959_v56  ;;  %v2187_v63 = vpop.f32.mrb[15].mxu0 }
 0x17f   : > { %2244 = vst.msk [vmem:[%s4278_s22 + $0x68] sm:$0xff] %vm2231_vm0, %v2602_v57  ;;  %v2604_v58 = vadd.f32 %v2187_v63, %v1961_v61 }
 0x180   : > { %2245 = vst [vmem:[%s4278_s22 + $0x70] sm:$0xff] %v2603_v62 }
 0x181   : > { %2246 = vst.msk [vmem:[%s4278_s22 + $0x78] sm:$0xff] %vm2231_vm0, %v2604_v58  ;;  %v1965_v59 = vpop.f32.mrb[16].mxu1 }
 0x182   : > { %v1967_v1 = vpop.f32.mrb[17].mxu1 }
 0x183   : > { %v2191_v0 = vpop.f32.mrb[16].mxu0  ;;  %v1969_v4 = vpop.f32.mrb[18].mxu1 }
 0x184   : > { %v2605_v2 = vadd.f32 %v2191_v0, %v1965_v59  ;;  %v2193_v3 = vpop.f32.mrb[17].mxu0  ;;  %v1971_v7 = vpop.f32.mrb[19].mxu1 }
 0x185   : > { %v2606_v5 = vadd.f32 %v2193_v3, %v1967_v1  ;;  %v2195_v6 = vpop.f32.mrb[18].mxu0 }
 0x186   : > { %2247 = vst [vmem:[%s4278_s22 + $0x80] sm:$0xff] %v2605_v2  ;;  %v2607_v8 = vadd.f32 %v2195_v6, %v1969_v4  ;;  %v2197_v9 = vpop.f32.mrb[19].mxu0 }
 0x187   : > { %2248 = vst.msk [vmem:[%s4278_s22 + $0x88] sm:$0xff] %vm2231_vm0, %v2606_v5  ;;  %v2608_v38 = vadd.f32 %v2197_v9, %v1971_v7 }
 0x188   : > { %2249 = vst [vmem:[%s4278_s22 + $0x90] sm:$0xff] %v2607_v8 }
 0x189   : > { %2250 = vst.msk [vmem:[%s4278_s22 + $0x98] sm:$0xff] %vm2231_vm0, %v2608_v38  ;;  %v1975_v39 = vpop.f32.mrb[20].mxu1 }
 0x18a   : > { %v1977_v12 = vpop.f32.mrb[21].mxu1 }
 0x18b   : > { %v2201_v10 = vpop.f32.mrb[20].mxu0  ;;  %v1979_v11 = vpop.f32.mrb[22].mxu1 }
 0x18c   : > { %v2609_v13 = vadd.f32 %v2201_v10, %v1975_v39  ;;  %v2203_v14 = vpop.f32.mrb[21].mxu0  ;;  %v1981_v15 = vpop.f32.mrb[23].mxu1 }
 0x18d   : > { %v2610_v49 = vadd.f32 %v2203_v14, %v1977_v12  ;;  %v2205_v50 = vpop.f32.mrb[22].mxu0 }
 0x18e   : > { %2251 = vst [vmem:[%s4278_s22 + $0xa0] sm:$0xff] %v2609_v13  ;;  %v2611_v16 = vadd.f32 %v2205_v50, %v1979_v11  ;;  %v2207_v17 = vpop.f32.mrb[23].mxu0 }
 0x18f   : > { %2252 = vst.msk [vmem:[%s4278_s22 + $0xa8] sm:$0xff] %vm2231_vm0, %v2610_v49  ;;  %v2612_v18 = vadd.f32 %v2207_v17, %v1981_v15 }
 0x190   : > { %2253 = vst [vmem:[%s4278_s22 + $0xb0] sm:$0xff] %v2611_v16 }
 0x191   : > { %2254 = vst.msk [vmem:[%s4278_s22 + $0xb8] sm:$0xff] %vm2231_vm0, %v2612_v18  ;;  %v1985_v19 = vpop.f32.mrb[24].mxu1 }
 0x192   : > { %v1987_v21 = vpop.f32.mrb[25].mxu1 }
 0x193   : > { %v2211_v20 = vpop.f32.mrb[24].mxu0  ;;  %v1989_v24 = vpop.f32.mrb[26].mxu1 }
 0x194   : > { %v2613_v22 = vadd.f32 %v2211_v20, %v1985_v19  ;;  %v2213_v23 = vpop.f32.mrb[25].mxu0  ;;  %v1991_v27 = vpop.f32.mrb[27].mxu1 }
 0x195   : > { %v2614_v25 = vadd.f32 %v2213_v23, %v1987_v21  ;;  %v2215_v26 = vpop.f32.mrb[26].mxu0 }
 0x196   : > { %2255 = vst [vmem:[%s4278_s22 + $0xc0] sm:$0xff] %v2613_v22  ;;  %v2615_v28 = vadd.f32 %v2215_v26, %v1989_v24  ;;  %v2217_v29 = vpop.f32.mrb[27].mxu0 }
 0x197   : > { %2256 = vst.msk [vmem:[%s4278_s22 + $0xc8] sm:$0xff] %vm2231_vm0, %v2614_v25  ;;  %v2616_v30 = vadd.f32 %v2217_v29, %v1991_v27 }
 0x198   : > { %2257 = vst [vmem:[%s4278_s22 + $0xd0] sm:$0xff] %v2615_v28 }
 0x199   : > { %2258 = vst.msk [vmem:[%s4278_s22 + $0xd8] sm:$0xff] %vm2231_vm0, %v2616_v30  ;;  %v1995_v31 = vpop.f32.mrb[28].mxu1 }
 0x19a   : > { %v1997_v33 = vpop.f32.mrb[29].mxu1 }
 0x19b   : > { %v2221_v32 = vpop.f32.mrb[28].mxu0  ;;  %v1999_v36 = vpop.f32.mrb[30].mxu1 }
 0x19c   : > { %v2617_v34 = vadd.f32 %v2221_v32, %v1995_v31  ;;  %v2223_v35 = vpop.f32.mrb[29].mxu0  ;;  %v2001_v41 = vpop.f32.mrb[31].mxu1 }
 0x19d   : > { %v2618_v37 = vadd.f32 %v2223_v35, %v1997_v33  ;;  %v2225_v40 = vpop.f32.mrb[30].mxu0 }
 0x19e   : > { %2259 = vst [vmem:[%s4278_s22 + $0xe0] sm:$0xff] %v2617_v34  ;;  %v2619_v42 = vadd.f32 %v2225_v40, %v1999_v36  ;;  %v2227_v43 = vpop.f32.mrb[31].mxu0 }
 0x19f   : > { %2260 = vst.msk [vmem:[%s4278_s22 + $0xe8] sm:$0xff] %vm2231_vm0, %v2618_v37  ;;  %v2620_v44 = vadd.f32 %v2227_v43, %v2001_v41 }
 0x1a0   : > { %2261 = vst [vmem:[%s4278_s22 + $0xf0] sm:$0xff] %v2619_v42 }
 0x1a1   : > { %2262 = vst.msk [vmem:[%s4278_s22 + $0xf8] sm:$0xff] %vm2231_vm0, %v2620_v44 }
 0x1a2 PF: > { %s13_s14 = sadd.s32 1, %s2732_s14   ;;  %s4342_s12 = smov %s2728_s13 }
 0x1a3   : > { %p10_p5 = scmp.ge.s32.totalorder %s13_s14, 4   ;;  %s4343_s13 = smov %s4345_s15 }
 0x1a5   :  { %12 = sbr.rel (!%p10_p5) target bundleno = 2 (0x2), region = 68 }

</bundles_post_ra>
